<compile_context>
chip_gen: v5e
topology: v5e:2x2
jax: 0.10.0
libtpu: 0.0.40
codegen_flags: <defaults>
</compile_context>

<pallas_src>
import functools
import math

import jax
import jax.numpy as jnp
from jax.experimental import pallas as pl
from jax.experimental.pallas import tpu as pltpu


def perceiver_attention_kernel(x_ref, lat_ref, ln_ref, wq_ref, wk_ref, wv_ref,
                               wo_ref, out_ref, *, batch_tile, heads, dim_head,
                               eps, compute_dtype, approx_recip):
    Bt = batch_tile
    rows_x, D = x_ref.shape
    rows_l, _ = lat_ref.shape
    N1 = rows_x // Bt
    N2 = rows_l // Bt
    Nk = N1 + N2
    inner = heads * dim_head

    lnp = ln_ref[...].astype(jnp.float32)            # (4, D): g1, b1, g2, b2
    g1, b1 = lnp[0:1, :], lnp[1:2, :]
    g2, b2 = lnp[2:3, :], lnp[3:4, :]

    def layernorm(v, g, b):
        v32 = v.astype(jnp.float32)
        mu = jnp.mean(v32, axis=-1, keepdims=True)
        var = jnp.mean(jnp.square(v32 - mu), axis=-1, keepdims=True)
        return (v32 - mu) * jax.lax.rsqrt(var + eps) * g + b

    # Batch is flattened into the row (sublane) axis -> tall, lane-dense slabs.
    x_n = layernorm(x_ref[...], g1, b1)              # (Bt*N1, D) f32
    lat_n = layernorm(lat_ref[...], g2, b2)          # (Bt*N2, D) f32

    cdt = compute_dtype
    x_c = x_n.astype(cdt)
    lat_c = lat_n.astype(cdt)

    # Per-batch [x ; latents] row concat (sublane concat, cheap) -> single K
    # and single V projection instead of separate x / latent projections.
    kv_in = jnp.concatenate(
        [x_c.reshape(Bt, N1, D), lat_c.reshape(Bt, N2, D)], axis=1)  # (Bt, Nk, D)
    kv2 = kv_in.reshape(Bt * Nk, D)

    # Projections: bf16 MXU operands, f32 accumulation.
    q = jnp.dot(lat_c, wq_ref[...], preferred_element_type=jnp.float32)  # (Bt*N2, inner)
    k = jnp.dot(kv2, wk_ref[...], preferred_element_type=jnp.float32)    # (Bt*Nk, inner)
    v = jnp.dot(kv2, wv_ref[...], preferred_element_type=jnp.float32)    # (Bt*Nk, inner)

    q3 = q.astype(cdt).reshape(Bt, N2, inner)
    k3 = k.astype(cdt).reshape(Bt, Nk, inner)
    v3 = v.astype(cdt).reshape(Bt, Nk, inner)

    # Reference scales q and k by dim_head**-0.25 each; applying dim_head**-0.5
    # once to the f32 scores is exact and keeps bf16 operand ranges untouched.
    scale = dim_head ** -0.5

    head_outs = []
    for h in range(heads):                           # small static unroll
        hs = slice(h * dim_head, (h + 1) * dim_head)
        qh = q3[:, :, hs]                            # (Bt, N2, dh)
        kh = k3[:, :, hs]                            # (Bt, Nk, dh)
        vh = v3[:, :, hs]                            # (Bt, Nk, dh)
        s = jnp.einsum("bqd,bkd->bqk", qh, kh,
                       preferred_element_type=jnp.float32) * scale      # f32
        m = jnp.max(s, axis=-1, keepdims=True)
        e = jnp.exp(s - m)
        denom = jnp.sum(e, axis=-1, keepdims=True)
        p = (e * pl.reciprocal(denom, approx=approx_recip)).astype(cdt)  # (Bt, N2, Nk)
        oh = jnp.einsum("bqk,bkd->bqd", p, vh,
                        preferred_element_type=jnp.float32)              # (Bt, N2, dh)
        head_outs.append(oh.reshape(Bt * N2, dim_head))

    # Fused output projection: one lane concat + one K=inner matmul (instead of
    # `heads` K=dim_head matmuls accumulated into a live f32 slab).
    o = jnp.concatenate(head_outs, axis=-1).astype(cdt)       # (Bt*N2, inner)
    out = jnp.dot(o, wo_ref[...], preferred_element_type=jnp.float32)
    out_ref[...] = out.astype(out_ref.dtype)


def _num_tensorcores():
    """Best-effort TensorCore count per device (megacore / v7x -> 2, else 1)."""
    try:
        info = pltpu.get_tpu_info()
        for name in ("num_cores", "core_count", "num_tensorcores",
                     "tensorcore_count", "num_cores_per_chip"):
            val = getattr(info, name, None)
            if val:
                return int(val)
    except Exception:
        pass
    try:
        kind = jax.devices()[0].device_kind.lower()
    except Exception:
        return 1
    if "lite" in kind or "v5e" in kind or "v6e" in kind or "v6" in kind:
        return 1
    if "v4" in kind or "v5p" in kind or "v7" in kind:
        return 2
    return 1


def _pick_batch_tile(batch, num_cores):
    """grid=1 on single-TC chips; otherwise largest tile giving >= num_cores steps."""
    if num_cores <= 1 or batch <= 1:
        return batch
    best = 1
    for d in range(1, batch + 1):
        if batch % d == 0 and batch // d >= num_cores:
            best = d
    return best


def _vmem_limit_bytes():
    cap = 64 * 1024 * 1024
    try:
        cap = int(pltpu.get_tpu_info().vmem_capacity_bytes)
    except Exception:
        pass
    # Leave headroom under physical VMEM; never below the 32 MiB default.
    return int(max(32 * 1024 * 1024, min(cap - 16 * 1024 * 1024, 100 * 1024 * 1024)))


def perceiver_attention(x, latents, params, *, heads, dim_head, eps=1e-5,
                        batch_tile=None, compute_dtype=jnp.bfloat16):
    B, N1, D = x.shape
    _, N2, _ = latents.shape
    inner = heads * dim_head
    g1, b1, g2, b2, wq, wkv, wo = params

    if batch_tile is None:
        batch_tile = _pick_batch_tile(B, _num_tensorcores())
    Bt = batch_tile
    assert B % Bt == 0, (B, Bt)

    cdt = compute_dtype
    # Host-side weight prep: split to_kv into lane-contiguous wk / wv (no lane
    # offset slicing in the kernel) and cast MXU operands to the compute dtype.
    wq_c = wq.astype(cdt)
    wk_c = wkv[:, :inner].astype(cdt)
    wv_c = wkv[:, inner:].astype(cdt)
    wo_c = wo.astype(cdt)
    # Pack the four LayerNorm vectors into one (4, D) block.
    ln = jnp.stack([g1, b1, g2, b2], axis=0).astype(jnp.float32)

    # Flatten batch into the row axis: each grid step processes Bt batch
    # elements as tall 2-D slabs (fills MXU rows, lane-dense loads/stores).
    x2 = x.reshape(B * N1, D)
    lat2 = latents.reshape(B * N2, D)

    kernel = functools.partial(
        perceiver_attention_kernel, batch_tile=Bt, heads=heads,
        dim_head=dim_head, eps=eps, compute_dtype=cdt,
        approx_recip=(cdt != jnp.float32))

    out2 = pl.pallas_call(
        kernel,
        out_shape=jax.ShapeDtypeStruct((B * N2, D), x.dtype),
        grid=(B // Bt,),
        in_specs=[
            pl.BlockSpec((Bt * N1, D), lambda i: (i, 0)),
            pl.BlockSpec((Bt * N2, D), lambda i: (i, 0)),
            pl.BlockSpec((4, D), lambda i: (0, 0)),
            pl.BlockSpec((D, inner), lambda i: (0, 0)),
            pl.BlockSpec((D, inner), lambda i: (0, 0)),
            pl.BlockSpec((D, inner), lambda i: (0, 0)),
            pl.BlockSpec((inner, D), lambda i: (0, 0)),
        ],
        out_specs=pl.BlockSpec((Bt * N2, D), lambda i: (i, 0)),
        compiler_params=pltpu.CompilerParams(
            dimension_semantics=("parallel",),
            vmem_limit_bytes=_vmem_limit_bytes()),
    )(x2, lat2, ln, wq_c, wk_c, wv_c, wo_c)

    return out2.reshape(B, N2, D)


def perceiver_attention_ref(x, latents, params, *, heads, dim_head, eps=1e-5):
    """Pure-JAX f32 reference mirroring the PyTorch forward."""
    g1, b1, g2, b2, wq, wkv, wo = params
    inner = heads * dim_head

    def ln(v, g, b):
        mu = jnp.mean(v, axis=-1, keepdims=True)
        var = jnp.mean((v - mu) ** 2, axis=-1, keepdims=True)
        return (v - mu) * jax.lax.rsqrt(var + eps) * g + b

    x_n = ln(x, g1, b1)
    lat_n = ln(latents, g2, b2)
    b, l, _ = lat_n.shape
    q = lat_n @ wq
    kv = jnp.concatenate([x_n, lat_n], axis=-2) @ wkv
    k, v = kv[..., :inner], kv[..., inner:]

    def to_heads(t):
        bs, length, _ = t.shape
        return t.reshape(bs, length, heads, -1).transpose(0, 2, 1, 3)

    q, k, v = to_heads(q), to_heads(k), to_heads(v)
    sc = 1.0 / math.sqrt(math.sqrt(dim_head))
    w = jnp.einsum("bhqd,bhkd->bhqk", q * sc, k * sc)
    w = jax.nn.softmax(w.astype(jnp.float32), axis=-1).astype(w.dtype)
    out = jnp.einsum("bhqk,bhkd->bhqd", w, v)
    out = out.transpose(0, 2, 1, 3).reshape(b, l, -1)
    return out @ wo


if __name__ == "__main__":
    # Small but lane-friendly shapes (D = inner = 128 -> unmasked 128-lane stores).
    B, N1, N2, D = 4, 16, 8, 128
    heads, dim_head = 4, 32
    inner = heads * dim_head

    key = jax.random.PRNGKey(0)
    kx, kl, kq, kkv, ko = jax.random.split(key, 5)

    x = jax.random.normal(kx, (B, N1, D), dtype=jnp.float32)
    latents = jax.random.normal(kl, (B, N2, D), dtype=jnp.float32)

    # Deterministic parameters (LayerNorm defaults; Linear weights (in, out)).
    g1 = jnp.ones((D,), jnp.float32)
    b1 = jnp.zeros((D,), jnp.float32)
    g2 = jnp.ones((D,), jnp.float32)
    b2 = jnp.zeros((D,), jnp.float32)
    wq = jax.random.normal(kq, (D, inner), dtype=jnp.float32) * (1.0 / math.sqrt(D))
    wkv = jax.random.normal(kkv, (D, 2 * inner), dtype=jnp.float32) * (1.0 / math.sqrt(D))
    wo = jax.random.normal(ko, (inner, D), dtype=jnp.float32) * (1.0 / math.sqrt(inner))
    params = (g1, b1, g2, b2, wq, wkv, wo)

    ref = perceiver_attention_ref(x, latents, params, heads=heads, dim_head=dim_head)

    # Exact path (f32 MXU operands): tight tolerance.
    out_f32 = perceiver_attention(x, latents, params, heads=heads,
                                  dim_head=dim_head, compute_dtype=jnp.float32)
    out_f32 = jax.block_until_ready(out_f32)
    assert out_f32.shape == (B, N2, D), out_f32.shape
    err_f32 = float(jnp.max(jnp.abs(out_f32 - ref)))
    assert jnp.allclose(out_f32, ref, atol=5e-3, rtol=5e-3), err_f32

    # Fast path (bf16 MXU operands, f32 accumulation/softmax): looser tolerance.
    out = perceiver_attention(x, latents, params, heads=heads, dim_head=dim_head)
    out = jax.block_until_ready(out)
    assert out.shape == (B, N2, D), out.shape
    err_bf16 = float(jnp.max(jnp.abs(out - ref)))
    assert jnp.allclose(out, ref, atol=4e-2, rtol=4e-2), err_bf16

    print("KERNEL_OK")
</pallas_src>

<mosaic_0001>
module attributes {stable_mosaic.version = 11 : i64} {
  func.func @perceiver_attention_kernel(%arg0: i32, %arg1: memref<64x128xf32, #tpu.memory_space<vmem>>, %arg2: memref<32x128xf32, #tpu.memory_space<vmem>>, %arg3: memref<4x128xf32, #tpu.memory_space<vmem>>, %arg4: memref<128x128xf32, #tpu.memory_space<vmem>>, %arg5: memref<128x128xf32, #tpu.memory_space<vmem>>, %arg6: memref<128x128xf32, #tpu.memory_space<vmem>>, %arg7: memref<128x128xf32, #tpu.memory_space<vmem>>, %arg8: memref<32x128xf32, #tpu.memory_space<vmem>>) attributes {dimension_semantics = [#tpu.dimension_semantics<parallel>], iteration_bounds = array<i64: 1>, scalar_prefetch = 0 : i64, scratch_operands = 0 : i64, tpu.core_type = #tpu.core_type<tc>, window_params = [{transform_indices = @transform_0, window_bounds = array<i64: 64, 128>}, {transform_indices = @transform_1, window_bounds = array<i64: 32, 128>}, {pipeline_mode = #tpu.pipeline_mode<synchronous>, transform_indices = @transform_2, window_bounds = array<i64: 4, 128>}, {pipeline_mode = #tpu.pipeline_mode<synchronous>, transform_indices = @transform_3, window_bounds = array<i64: 128, 128>}, {pipeline_mode = #tpu.pipeline_mode<synchronous>, transform_indices = @transform_4, window_bounds = array<i64: 128, 128>}, {pipeline_mode = #tpu.pipeline_mode<synchronous>, transform_indices = @transform_5, window_bounds = array<i64: 128, 128>}, {pipeline_mode = #tpu.pipeline_mode<synchronous>, transform_indices = @transform_6, window_bounds = array<i64: 128, 128>}, {transform_indices = @transform_7, window_bounds = array<i64: 32, 128>}]} {
    %c0 = arith.constant 0 : index
    %c0_0 = arith.constant 0 : index
    %0 = vector.load %arg3[%c0, %c0_0] : memref<4x128xf32, #tpu.memory_space<vmem>>, vector<4x128xf32>
    %1 = vector.extract_strided_slice %0 {offsets = [0, 0], sizes = [1, 128], strides = [1, 1]} : vector<4x128xf32> to vector<1x128xf32>
    %2 = vector.extract_strided_slice %0 {offsets = [1, 0], sizes = [1, 128], strides = [1, 1]} : vector<4x128xf32> to vector<1x128xf32>
    %3 = vector.extract_strided_slice %0 {offsets = [2, 0], sizes = [1, 128], strides = [1, 1]} : vector<4x128xf32> to vector<1x128xf32>
    %4 = vector.extract_strided_slice %0 {offsets = [3, 0], sizes = [1, 128], strides = [1, 1]} : vector<4x128xf32> to vector<1x128xf32>
    %c0_1 = arith.constant 0 : index
    %c0_2 = arith.constant 0 : index
    %5 = vector.load %arg1[%c0_1, %c0_2] : memref<64x128xf32, #tpu.memory_space<vmem>>, vector<64x128xf32>
    %cst = arith.constant dense<0.000000e+00> : vector<64xf32>
    %6 = vector.multi_reduction <add>, %5, %cst [1] : vector<64x128xf32> to vector<64xf32>
    %7 = vector.shape_cast %6 : vector<64xf32> to vector<64x1xf32>
    %cst_3 = arith.constant 1.280000e+02 : f32
    %8 = vector.broadcast %cst_3 : f32 to vector<64x1xf32>
    %9 = arith.divf %7, %8 : vector<64x1xf32>
    %10 = vector.broadcast %9 : vector<64x1xf32> to vector<64x128xf32>
    %11 = arith.subf %5, %10 : vector<64x128xf32>
    %12 = arith.mulf %11, %11 : vector<64x128xf32>
    %cst_4 = arith.constant dense<0.000000e+00> : vector<64xf32>
    %13 = vector.multi_reduction <add>, %12, %cst_4 [1] : vector<64x128xf32> to vector<64xf32>
    %14 = vector.shape_cast %13 : vector<64xf32> to vector<64x1xf32>
    %cst_5 = arith.constant 1.280000e+02 : f32
    %15 = vector.broadcast %cst_5 : f32 to vector<64x1xf32>
    %16 = arith.divf %14, %15 : vector<64x1xf32>
    %17 = vector.broadcast %9 : vector<64x1xf32> to vector<64x128xf32>
    %18 = arith.subf %5, %17 : vector<64x128xf32>
    %cst_6 = arith.constant 9.99999974E-6 : f32
    %19 = vector.broadcast %cst_6 : f32 to vector<64x1xf32>
    %20 = arith.addf %16, %19 : vector<64x1xf32>
    %21 = math.rsqrt %20 : vector<64x1xf32>
    %22 = vector.broadcast %21 : vector<64x1xf32> to vector<64x128xf32>
    %23 = arith.mulf %18, %22 : vector<64x128xf32>
    %24 = vector.broadcast %1 : vector<1x128xf32> to vector<64x128xf32>
    %25 = arith.mulf %23, %24 : vector<64x128xf32>
    %26 = vector.broadcast %2 : vector<1x128xf32> to vector<64x128xf32>
    %27 = arith.addf %25, %26 : vector<64x128xf32>
    %c0_7 = arith.constant 0 : index
    %c0_8 = arith.constant 0 : index
    %28 = vector.load %arg2[%c0_7, %c0_8] : memref<32x128xf32, #tpu.memory_space<vmem>>, vector<32x128xf32>
    %cst_9 = arith.constant dense<0.000000e+00> : vector<32xf32>
    %29 = vector.multi_reduction <add>, %28, %cst_9 [1] : vector<32x128xf32> to vector<32xf32>
    %30 = vector.shape_cast %29 : vector<32xf32> to vector<32x1xf32>
    %cst_10 = arith.constant 1.280000e+02 : f32
    %31 = vector.broadcast %cst_10 : f32 to vector<32x1xf32>
    %32 = arith.divf %30, %31 : vector<32x1xf32>
    %33 = vector.broadcast %32 : vector<32x1xf32> to vector<32x128xf32>
    %34 = arith.subf %28, %33 : vector<32x128xf32>
    %35 = arith.mulf %34, %34 : vector<32x128xf32>
    %cst_11 = arith.constant dense<0.000000e+00> : vector<32xf32>
    %36 = vector.multi_reduction <add>, %35, %cst_11 [1] : vector<32x128xf32> to vector<32xf32>
    %37 = vector.shape_cast %36 : vector<32xf32> to vector<32x1xf32>
    %cst_12 = arith.constant 1.280000e+02 : f32
    %38 = vector.broadcast %cst_12 : f32 to vector<32x1xf32>
    %39 = arith.divf %37, %38 : vector<32x1xf32>
    %40 = vector.broadcast %32 : vector<32x1xf32> to vector<32x128xf32>
    %41 = arith.subf %28, %40 : vector<32x128xf32>
    %cst_13 = arith.constant 9.99999974E-6 : f32
    %42 = vector.broadcast %cst_13 : f32 to vector<32x1xf32>
    %43 = arith.addf %39, %42 : vector<32x1xf32>
    %44 = math.rsqrt %43 : vector<32x1xf32>
    %45 = vector.broadcast %44 : vector<32x1xf32> to vector<32x128xf32>
    %46 = arith.mulf %41, %45 : vector<32x128xf32>
    %47 = vector.broadcast %3 : vector<1x128xf32> to vector<32x128xf32>
    %48 = arith.mulf %46, %47 : vector<32x128xf32>
    %49 = vector.broadcast %4 : vector<1x128xf32> to vector<32x128xf32>
    %50 = arith.addf %48, %49 : vector<32x128xf32>
    %51 = vector.shape_cast %27 : vector<64x128xf32> to vector<4x16x128xf32>
    %52 = vector.shape_cast %50 : vector<32x128xf32> to vector<4x8x128xf32>
    %53 = tpu.concatenate %51, %52 in 1 : vector<4x16x128xf32>, vector<4x8x128xf32> -> vector<4x24x128xf32>
    %54 = vector.shape_cast %53 : vector<4x24x128xf32> to vector<96x128xf32>
    %c0_14 = arith.constant 0 : index
    %c0_15 = arith.constant 0 : index
    %55 = vector.load %arg4[%c0_14, %c0_15] : memref<128x128xf32, #tpu.memory_space<vmem>>, vector<128x128xf32>
    %cst_16 = arith.constant dense<0.000000e+00> : vector<32x128xf32>
    %56 = tpu.matmul %50, %55, %cst_16 {dimension_numbers = #tpu.dot_dimension_numbers<[1], [0], [0], [1], [0, 0, 1, 1], [], []>} : vector<32x128xf32>, vector<128x128xf32>, vector<32x128xf32> -> vector<32x128xf32>
    %c0_17 = arith.constant 0 : index
    %c0_18 = arith.constant 0 : index
    %57 = vector.load %arg5[%c0_17, %c0_18] : memref<128x128xf32, #tpu.memory_space<vmem>>, vector<128x128xf32>
    %cst_19 = arith.constant dense<0.000000e+00> : vector<96x128xf32>
    %58 = tpu.matmul %54, %57, %cst_19 {dimension_numbers = #tpu.dot_dimension_numbers<[1], [0], [0], [1], [0, 0, 1, 1], [], []>} : vector<96x128xf32>, vector<128x128xf32>, vector<96x128xf32> -> vector<96x128xf32>
    %c0_20 = arith.constant 0 : index
    %c0_21 = arith.constant 0 : index
    %59 = vector.load %arg6[%c0_20, %c0_21] : memref<128x128xf32, #tpu.memory_space<vmem>>, vector<128x128xf32>
    %cst_22 = arith.constant dense<0.000000e+00> : vector<96x128xf32>
    %60 = tpu.matmul %54, %59, %cst_22 {dimension_numbers = #tpu.dot_dimension_numbers<[1], [0], [0], [1], [0, 0, 1, 1], [], []>} : vector<96x128xf32>, vector<128x128xf32>, vector<96x128xf32> -> vector<96x128xf32>
    %61 = vector.shape_cast %56 : vector<32x128xf32> to vector<4x8x128xf32>
    %62 = vector.shape_cast %58 : vector<96x128xf32> to vector<4x24x128xf32>
    %63 = vector.shape_cast %60 : vector<96x128xf32> to vector<4x24x128xf32>
    %64 = vector.extract_strided_slice %61 {offsets = [0, 0, 0], sizes = [4, 8, 32], strides = [1, 1, 1]} : vector<4x8x128xf32> to vector<4x8x32xf32>
    %65 = vector.extract_strided_slice %62 {offsets = [0, 0, 0], sizes = [4, 24, 32], strides = [1, 1, 1]} : vector<4x24x128xf32> to vector<4x24x32xf32>
    %66 = vector.extract_strided_slice %63 {offsets = [0, 0, 0], sizes = [4, 24, 32], strides = [1, 1, 1]} : vector<4x24x128xf32> to vector<4x24x32xf32>
    "tpu.trace_start"() <{level = 10 : i32, message = "bqd,bkd->bqk"}> : () -> ()
    %cst_23 = arith.constant dense<0.000000e+00> : vector<4x8x24xf32>
    %67 = tpu.matmul %64, %65, %cst_23 {dimension_numbers = #tpu.dot_dimension_numbers<[2], [2], [1], [1], [0, 0, 0, 1, 1, 1], [0], [0]>} : vector<4x8x32xf32>, vector<4x24x32xf32>, vector<4x8x24xf32> -> vector<4x8x24xf32>
    "tpu.trace_stop"() : () -> ()
    %cst_24 = arith.constant 0.176776692 : f32
    %68 = vector.broadcast %cst_24 : f32 to vector<4x8x24xf32>
    %69 = arith.mulf %67, %68 : vector<4x8x24xf32>
    %cst_25 = arith.constant dense<0xFF800000> : vector<4x8xf32>
    %70 = vector.multi_reduction <maximumf>, %69, %cst_25 [2] : vector<4x8x24xf32> to vector<4x8xf32>
    %71 = vector.shape_cast %70 : vector<4x8xf32> to vector<4x8x1xf32>
    %72 = vector.broadcast %71 : vector<4x8x1xf32> to vector<4x8x24xf32>
    %73 = arith.subf %69, %72 : vector<4x8x24xf32>
    %74 = math.exp %73 : vector<4x8x24xf32>
    %cst_26 = arith.constant dense<0.000000e+00> : vector<4x8xf32>
    %75 = vector.multi_reduction <add>, %74, %cst_26 [2] : vector<4x8x24xf32> to vector<4x8xf32>
    %76 = vector.shape_cast %75 : vector<4x8xf32> to vector<4x8x1xf32>
    %77 = tpu.reciprocal %76 : vector<4x8x1xf32> -> vector<4x8x1xf32>
    %78 = vector.broadcast %77 : vector<4x8x1xf32> to vector<4x8x24xf32>
    %79 = arith.mulf %74, %78 : vector<4x8x24xf32>
    "tpu.trace_start"() <{level = 10 : i32, message = "bqk,bkd->bqd"}> : () -> ()
    %cst_27 = arith.constant dense<0.000000e+00> : vector<4x8x32xf32>
    %80 = tpu.matmul %79, %66, %cst_27 {dimension_numbers = #tpu.dot_dimension_numbers<[2], [1], [1], [2], [0, 0, 0, 1, 1, 2], [0], [0]>} : vector<4x8x24xf32>, vector<4x24x32xf32>, vector<4x8x32xf32> -> vector<4x8x32xf32>
    "tpu.trace_stop"() : () -> ()
    %81 = vector.shape_cast %80 : vector<4x8x32xf32> to vector<32x32xf32>
    %82 = vector.extract_strided_slice %61 {offsets = [0, 0, 32], sizes = [4, 8, 32], strides = [1, 1, 1]} : vector<4x8x128xf32> to vector<4x8x32xf32>
    %83 = vector.extract_strided_slice %62 {offsets = [0, 0, 32], sizes = [4, 24, 32], strides = [1, 1, 1]} : vector<4x24x128xf32> to vector<4x24x32xf32>
    %84 = vector.extract_strided_slice %63 {offsets = [0, 0, 32], sizes = [4, 24, 32], strides = [1, 1, 1]} : vector<4x24x128xf32> to vector<4x24x32xf32>
    "tpu.trace_start"() <{level = 10 : i32, message = "bqd,bkd->bqk"}> : () -> ()
    %cst_28 = arith.constant dense<0.000000e+00> : vector<4x8x24xf32>
    %85 = tpu.matmul %82, %83, %cst_28 {dimension_numbers = #tpu.dot_dimension_numbers<[2], [2], [1], [1], [0, 0, 0, 1, 1, 1], [0], [0]>} : vector<4x8x32xf32>, vector<4x24x32xf32>, vector<4x8x24xf32> -> vector<4x8x24xf32>
    "tpu.trace_stop"() : () -> ()
    %cst_29 = arith.constant 0.176776692 : f32
    %86 = vector.broadcast %cst_29 : f32 to vector<4x8x24xf32>
    %87 = arith.mulf %85, %86 : vector<4x8x24xf32>
    %cst_30 = arith.constant dense<0xFF800000> : vector<4x8xf32>
    %88 = vector.multi_reduction <maximumf>, %87, %cst_30 [2] : vector<4x8x24xf32> to vector<4x8xf32>
    %89 = vector.shape_cast %88 : vector<4x8xf32> to vector<4x8x1xf32>
    %90 = vector.broadcast %89 : vector<4x8x1xf32> to vector<4x8x24xf32>
    %91 = arith.subf %87, %90 : vector<4x8x24xf32>
    %92 = math.exp %91 : vector<4x8x24xf32>
    %cst_31 = arith.constant dense<0.000000e+00> : vector<4x8xf32>
    %93 = vector.multi_reduction <add>, %92, %cst_31 [2] : vector<4x8x24xf32> to vector<4x8xf32>
    %94 = vector.shape_cast %93 : vector<4x8xf32> to vector<4x8x1xf32>
    %95 = tpu.reciprocal %94 : vector<4x8x1xf32> -> vector<4x8x1xf32>
    %96 = vector.broadcast %95 : vector<4x8x1xf32> to vector<4x8x24xf32>
    %97 = arith.mulf %92, %96 : vector<4x8x24xf32>
    "tpu.trace_start"() <{level = 10 : i32, message = "bqk,bkd->bqd"}> : () -> ()
    %cst_32 = arith.constant dense<0.000000e+00> : vector<4x8x32xf32>
    %98 = tpu.matmul %97, %84, %cst_32 {dimension_numbers = #tpu.dot_dimension_numbers<[2], [1], [1], [2], [0, 0, 0, 1, 1, 2], [0], [0]>} : vector<4x8x24xf32>, vector<4x24x32xf32>, vector<4x8x32xf32> -> vector<4x8x32xf32>
    "tpu.trace_stop"() : () -> ()
    %99 = vector.shape_cast %98 : vector<4x8x32xf32> to vector<32x32xf32>
    %100 = vector.extract_strided_slice %61 {offsets = [0, 0, 64], sizes = [4, 8, 32], strides = [1, 1, 1]} : vector<4x8x128xf32> to vector<4x8x32xf32>
    %101 = vector.extract_strided_slice %62 {offsets = [0, 0, 64], sizes = [4, 24, 32], strides = [1, 1, 1]} : vector<4x24x128xf32> to vector<4x24x32xf32>
    %102 = vector.extract_strided_slice %63 {offsets = [0, 0, 64], sizes = [4, 24, 32], strides = [1, 1, 1]} : vector<4x24x128xf32> to vector<4x24x32xf32>
    "tpu.trace_start"() <{level = 10 : i32, message = "bqd,bkd->bqk"}> : () -> ()
    %cst_33 = arith.constant dense<0.000000e+00> : vector<4x8x24xf32>
    %103 = tpu.matmul %100, %101, %cst_33 {dimension_numbers = #tpu.dot_dimension_numbers<[2], [2], [1], [1], [0, 0, 0, 1, 1, 1], [0], [0]>} : vector<4x8x32xf32>, vector<4x24x32xf32>, vector<4x8x24xf32> -> vector<4x8x24xf32>
    "tpu.trace_stop"() : () -> ()
    %cst_34 = arith.constant 0.176776692 : f32
    %104 = vector.broadcast %cst_34 : f32 to vector<4x8x24xf32>
    %105 = arith.mulf %103, %104 : vector<4x8x24xf32>
    %cst_35 = arith.constant dense<0xFF800000> : vector<4x8xf32>
    %106 = vector.multi_reduction <maximumf>, %105, %cst_35 [2] : vector<4x8x24xf32> to vector<4x8xf32>
    %107 = vector.shape_cast %106 : vector<4x8xf32> to vector<4x8x1xf32>
    %108 = vector.broadcast %107 : vector<4x8x1xf32> to vector<4x8x24xf32>
    %109 = arith.subf %105, %108 : vector<4x8x24xf32>
    %110 = math.exp %109 : vector<4x8x24xf32>
    %cst_36 = arith.constant dense<0.000000e+00> : vector<4x8xf32>
    %111 = vector.multi_reduction <add>, %110, %cst_36 [2] : vector<4x8x24xf32> to vector<4x8xf32>
    %112 = vector.shape_cast %111 : vector<4x8xf32> to vector<4x8x1xf32>
    %113 = tpu.reciprocal %112 : vector<4x8x1xf32> -> vector<4x8x1xf32>
    %114 = vector.broadcast %113 : vector<4x8x1xf32> to vector<4x8x24xf32>
    %115 = arith.mulf %110, %114 : vector<4x8x24xf32>
    "tpu.trace_start"() <{level = 10 : i32, message = "bqk,bkd->bqd"}> : () -> ()
    %cst_37 = arith.constant dense<0.000000e+00> : vector<4x8x32xf32>
    %116 = tpu.matmul %115, %102, %cst_37 {dimension_numbers = #tpu.dot_dimension_numbers<[2], [1], [1], [2], [0, 0, 0, 1, 1, 2], [0], [0]>} : vector<4x8x24xf32>, vector<4x24x32xf32>, vector<4x8x32xf32> -> vector<4x8x32xf32>
    "tpu.trace_stop"() : () -> ()
    %117 = vector.shape_cast %116 : vector<4x8x32xf32> to vector<32x32xf32>
    %118 = vector.extract_strided_slice %61 {offsets = [0, 0, 96], sizes = [4, 8, 32], strides = [1, 1, 1]} : vector<4x8x128xf32> to vector<4x8x32xf32>
    %119 = vector.extract_strided_slice %62 {offsets = [0, 0, 96], sizes = [4, 24, 32], strides = [1, 1, 1]} : vector<4x24x128xf32> to vector<4x24x32xf32>
    %120 = vector.extract_strided_slice %63 {offsets = [0, 0, 96], sizes = [4, 24, 32], strides = [1, 1, 1]} : vector<4x24x128xf32> to vector<4x24x32xf32>
    "tpu.trace_start"() <{level = 10 : i32, message = "bqd,bkd->bqk"}> : () -> ()
    %cst_38 = arith.constant dense<0.000000e+00> : vector<4x8x24xf32>
    %121 = tpu.matmul %118, %119, %cst_38 {dimension_numbers = #tpu.dot_dimension_numbers<[2], [2], [1], [1], [0, 0, 0, 1, 1, 1], [0], [0]>} : vector<4x8x32xf32>, vector<4x24x32xf32>, vector<4x8x24xf32> -> vector<4x8x24xf32>
    "tpu.trace_stop"() : () -> ()
    %cst_39 = arith.constant 0.176776692 : f32
    %122 = vector.broadcast %cst_39 : f32 to vector<4x8x24xf32>
    %123 = arith.mulf %121, %122 : vector<4x8x24xf32>
    %cst_40 = arith.constant dense<0xFF800000> : vector<4x8xf32>
    %124 = vector.multi_reduction <maximumf>, %123, %cst_40 [2] : vector<4x8x24xf32> to vector<4x8xf32>
    %125 = vector.shape_cast %124 : vector<4x8xf32> to vector<4x8x1xf32>
    %126 = vector.broadcast %125 : vector<4x8x1xf32> to vector<4x8x24xf32>
    %127 = arith.subf %123, %126 : vector<4x8x24xf32>
    %128 = math.exp %127 : vector<4x8x24xf32>
    %cst_41 = arith.constant dense<0.000000e+00> : vector<4x8xf32>
    %129 = vector.multi_reduction <add>, %128, %cst_41 [2] : vector<4x8x24xf32> to vector<4x8xf32>
    %130 = vector.shape_cast %129 : vector<4x8xf32> to vector<4x8x1xf32>
    %131 = tpu.reciprocal %130 : vector<4x8x1xf32> -> vector<4x8x1xf32>
    %132 = vector.broadcast %131 : vector<4x8x1xf32> to vector<4x8x24xf32>
    %133 = arith.mulf %128, %132 : vector<4x8x24xf32>
    "tpu.trace_start"() <{level = 10 : i32, message = "bqk,bkd->bqd"}> : () -> ()
    %cst_42 = arith.constant dense<0.000000e+00> : vector<4x8x32xf32>
    %134 = tpu.matmul %133, %120, %cst_42 {dimension_numbers = #tpu.dot_dimension_numbers<[2], [1], [1], [2], [0, 0, 0, 1, 1, 2], [0], [0]>} : vector<4x8x24xf32>, vector<4x24x32xf32>, vector<4x8x32xf32> -> vector<4x8x32xf32>
    "tpu.trace_stop"() : () -> ()
    %135 = vector.shape_cast %134 : vector<4x8x32xf32> to vector<32x32xf32>
    %136 = tpu.concatenate %81, %99, %117, %135 in 1 : vector<32x32xf32>, vector<32x32xf32>, vector<32x32xf32>, vector<32x32xf32> -> vector<32x128xf32>
    %c0_43 = arith.constant 0 : index
    %c0_44 = arith.constant 0 : index
    %137 = vector.load %arg7[%c0_43, %c0_44] : memref<128x128xf32, #tpu.memory_space<vmem>>, vector<128x128xf32>
    %cst_45 = arith.constant dense<0.000000e+00> : vector<32x128xf32>
    %138 = tpu.matmul %136, %137, %cst_45 {dimension_numbers = #tpu.dot_dimension_numbers<[1], [0], [0], [1], [0, 0, 1, 1], [], []>} : vector<32x128xf32>, vector<128x128xf32>, vector<32x128xf32> -> vector<32x128xf32>
    %c0_46 = arith.constant 0 : index
    %c0_47 = arith.constant 0 : index
    %139 = vector.load %arg8[%c0_46, %c0_47] : memref<32x128xf32, #tpu.memory_space<vmem>>, vector<32x128xf32>
    tpu.vector_store %arg8[%c0_46, %c0_47], %138 {strides = array<i32>} : memref<32x128xf32, #tpu.memory_space<vmem>>, vector<32x128xf32>,
    return
  }
  func.func @transform_0(%arg0: i32) -> (i32, i32) {
    %c0_i32 = arith.constant 0 : i32
    %c0_i32_0 = arith.constant 0 : i32
    return %arg0, %c0_i32 : i32, i32
  }
  func.func @transform_1(%arg0: i32) -> (i32, i32) {
    %c0_i32 = arith.constant 0 : i32
    %c0_i32_0 = arith.constant 0 : i32
    return %arg0, %c0_i32 : i32, i32
  }
  func.func @transform_2(%arg0: i32) -> (i32, i32) {
    %c0_i32 = arith.constant 0 : i32
    %c0_i32_0 = arith.constant 0 : i32
    %c0_i32_1 = arith.constant 0 : i32
    return %c0_i32, %c0_i32_0 : i32, i32
  }
  func.func @transform_3(%arg0: i32) -> (i32, i32) {
    %c0_i32 = arith.constant 0 : i32
    %c0_i32_0 = arith.constant 0 : i32
    %c0_i32_1 = arith.constant 0 : i32
    return %c0_i32, %c0_i32_0 : i32, i32
  }
  func.func @transform_4(%arg0: i32) -> (i32, i32) {
    %c0_i32 = arith.constant 0 : i32
    %c0_i32_0 = arith.constant 0 : i32
    %c0_i32_1 = arith.constant 0 : i32
    return %c0_i32, %c0_i32_0 : i32, i32
  }
  func.func @transform_5(%arg0: i32) -> (i32, i32) {
    %c0_i32 = arith.constant 0 : i32
    %c0_i32_0 = arith.constant 0 : i32
    %c0_i32_1 = arith.constant 0 : i32
    return %c0_i32, %c0_i32_0 : i32, i32
  }
  func.func @transform_6(%arg0: i32) -> (i32, i32) {
    %c0_i32 = arith.constant 0 : i32
    %c0_i32_0 = arith.constant 0 : i32
    %c0_i32_1 = arith.constant 0 : i32
    return %c0_i32, %c0_i32_0 : i32, i32
  }
  func.func @transform_7(%arg0: i32) -> (i32, i32) {
    %c0_i32 = arith.constant 0 : i32
    %c0_i32_0 = arith.constant 0 : i32
    return %arg0, %c0_i32 : i32, i32
  }
}

</mosaic_0001>

<bundles_post_ra>
// kernel: tpu_custom_call.1
= control target key start
LH: loop header
LB: loop body
LE: loop exit
PB: predicated region body
PF: predicated region fallthrough
CT: control target
= control target key end

     0   :  { %12 = vsyncpa [#allocation3], 0  ;;  %s3572_s0 = inlined_call_operand.hbm [shape: f32[64,128], index: 0, kind: input, shape index: {}]   ;;  %s3573_s1 = inlined_call_operand.hbm [shape: f32[32,128], index: 1, kind: input, shape index: {}]   ;;  %s3574_s2 = inlined_call_operand.hbm [shape: f32[4,128], index: 2, kind: input, shape index: {}]   ;;  %s3575_s3 = inlined_call_operand.hbm [shape: f32[128,128], index: 3, kind: input, shape index: {}]   ;;  %s3576_s4 = inlined_call_operand.hbm [shape: f32[128,128], index: 4, kind: input, shape index: {}]   ;;  %s3577_s5 = inlined_call_operand.hbm [shape: f32[128,128], index: 5, kind: input, shape index: {}]   ;;  %s3578_s6 = inlined_call_operand.hbm [shape: f32[128,128], index: 6, kind: input, shape index: {}]   ;;  %s3579_s7 = inlined_call_operand.hbm [shape: f32[32,128], index: 7, kind: output, shape index: {}]  }
   0x1   :  { %13 = vsyncpa [#allocation6], 0 }
   0x2   :  { %14 = vsyncpa [#allocation9], 0 }
   0x3   :  { %15 = vsyncpa [#allocation12], 0 }
   0x4   :  { %16 = vsyncpa [#allocation4], 0  ;;  %s34_s26 = sshll.u32 %s3573_s1, 4  ;;  %s2680_s27 = smov [#allocation5]   ;;  %s35_s26 = int_to_ptr.hbm [resolvable:$true] %s34_s26 }
   0x5   :  { %s36_s28 = sshll.u32 %s2680_s27, 4  ;;  %s58_s8 = sshll.u32 %s3575_s3, 4  ;;  %s37_s28 = int_to_ptr.vmem [resolvable:$true] %s36_s28  ;;  %s59_s8 = int_to_ptr.hbm [resolvable:$true] %s58_s8 }
   0x6   :  { %s2681_s9 = smov 128   ;;  %s2682_s10 = smov 8  }
   0x7   :  { %42 = dma.hbm_to_vmem [thread:$0]  %s35_s26, 512, %s37_s28, [#allocation6], %s2681_s9, %s2681_s9, %s2682_s10  }
   0x8   :  { %s2683_s11 = smov [#allocation8]   ;;  %s84_s1 = sshll.u32 %s3577_s5, 4  ;;  %s85_s1 = int_to_ptr.hbm [resolvable:$true] %s84_s1 }
   0x9   :  { %s60_s12 = sshll.u32 %s2683_s11, 4  ;;  %s21_s16 = sshll.u32 %s3572_s0, 4  ;;  %s61_s12 = int_to_ptr.vmem [resolvable:$true] %s60_s12  ;;  %s22_s16 = int_to_ptr.hbm [resolvable:$true] %s21_s16 }
   0xa   :  { %66 = dma.hbm_to_vmem [thread:$0]  %s59_s8, 2048, %s61_s12, [#allocation9], %s2681_s9, %s2681_s9, %s2682_s10  }
   0xb   :  { %s2684_s17 = smov [#allocation11]   ;;  %s2685_s19 = smov [#allocation2]  }
   0xc   :  { %s86_s18 = sshll.u32 %s2684_s17, 4  ;;  %s23_s5 = sshll.u32 %s2685_s19, 4  ;;  %s87_s18 = int_to_ptr.vmem [resolvable:$true] %s86_s18  ;;  %s24_s5 = int_to_ptr.vmem [resolvable:$true] %s23_s5 }
   0xd   :  { %92 = dma.hbm_to_vmem [thread:$0]  %s85_s1, 2048, %s87_s18, [#allocation12], %s2681_s9, %s2681_s9, %s2682_s10  }
   0xe   :  { %s48_s22 = sshll.u32 %s3574_s2, 4  ;;  %s71_s24 = sshll.u32 %s3576_s4, 4  ;;  %s49_s22 = int_to_ptr.hbm [resolvable:$true] %s48_s22  ;;  %s72_s24 = int_to_ptr.hbm [resolvable:$true] %s71_s24 }
   0xf   :  { %29 = dma.hbm_to_vmem [thread:$0]  %s22_s16, 1024, %s24_s5, [#allocation3], %s2681_s9, %s2681_s9, %s2682_s10  }
  0x10   :  { %s2686_s25 = smov [#allocation7]   ;;  %s2687_s27 = smov [#allocation10]  }
  0x11   :  { %s50_s26 = sshll.u32 %s2686_s25, 4  ;;  %s73_s28 = sshll.u32 %s2687_s27, 4  ;;  %s51_s26 = int_to_ptr.vmem [resolvable:$true] %s50_s26  ;;  %s74_s28 = int_to_ptr.vmem [resolvable:$true] %s73_s28 }
  0x12   :  { %53 = dma.hbm_to_vmem [thread:$0]  %s49_s22, 64, %s51_s26, [#allocation6]  }
  0x13   :  { %s97_s2 = sshll.u32 %s3578_s6, 4  ;;  %s2688_s8 = smov [#allocation13]   ;;  %s98_s2 = int_to_ptr.hbm [resolvable:$true] %s97_s2 }
  0x14   :  { %79 = dma.hbm_to_vmem [thread:$0]  %s72_s24, 2048, %s74_s28, [#allocation9], %s2681_s9, %s2681_s9, %s2682_s10  }
  0x15   :  { %s99_s11 = sshll.u32 %s2688_s8, 4  ;;  %s100_s11 = int_to_ptr.vmem [resolvable:$true] %s99_s11 }
  0x16   :  { %105 = dma.hbm_to_vmem [thread:$0]  %s98_s2, 2048, %s100_s11, [#allocation12], %s2681_s9, %s2681_s9, %s2682_s10  }
  0x17   :  { %2670 = dma.done.wait [#allocation3], 1024  }
  0x18   :  { %2671 = vsyncadd [#allocation3], 4294966272 }
  0x19   :  { %2672 = dma.done.wait [#allocation6], 576  }
  0x1a   :  { %2673 = vsyncadd [#allocation6], 4294966720 }
  0x1b   :  { %2674 = dma.done.wait [#allocation9], 4096  }
  0x1c   :  { %2675 = vsyncadd [#allocation9], 4294963200 }
  0x1d   :  { %2676 = dma.done.wait [#allocation12], 4096  }
  0x1e   :  { %2677 = vsyncadd [#allocation12], 4294963200  ;;  %v328_v0 = vld [vmem:[#allocation5] sm:$0xff]  ;;  %v138_v2 = vld [vmem:[#allocation2 + $0x18] sm:$0xff]  ;;  %v2689_v7 = vmov 128.0   ;;  %s2690_s4 = smov 96  }
  0x1f   :  { %v135_v1 = vld [vmem:[#allocation2] sm:$0xff]  ;;  %332 = vadd.xlane.f32.xlu1 %v328_v0  ;;  %149 = vadd.xlane.f32.xlu2 %v138_v2  ;;  %v136_v3 = vld [vmem:[#allocation2 + $0x8] sm:$0xff]  ;;  %v137_v4 = vld [vmem:[#allocation2 + $0x10] sm:$0xff]  ;;  %2388 = vrcp.f32 %v2689_v7  ;;  %s2691_s6 = smov 64   ;;  %s2692_s12 = smov 32  }
  0x20   :  { %143 = vadd.xlane.f32.xlu0 %v135_v1  ;;  %v329_v5 = vld [vmem:[#allocation5 + $0x8] sm:$0xff]  ;;  %v139_v6 = vld [vmem:[#allocation2 + $0x20] sm:$0xff]  ;;  %v436_v27 = vld [vmem:[#allocation8 + $0x70] sm:$0xff]  ;;  %s2693_s13 = smov [#allocation14]   ;;  %s2172_s15 = sshll.u32 %s3579_s7, 4  ;;  %s2173_s15 = int_to_ptr.hbm [resolvable:$true] %s2172_s15 }
  0x21   :  { %v437_v25 = vld [vmem:[#allocation8 + $0x78] sm:$0xff]  ;;  %v481_v30 = vld [vmem:[#allocation10 + $0x70] sm:$0xff]  ;;  %v2794_v35 = vld [vmem:[#allocation2 + $0x28] sm:$0xff]  ;;  %s2170_s14 = sshll.u32 %s2693_s13, 4  ;;  %s2171_s14 = int_to_ptr.vmem [resolvable:$true] %s2170_s14 }
  0x22   :  { %v482_v26 = vld [vmem:[#allocation10 + $0x78] sm:$0xff]  ;;  %438 = vmatpush.msra.mxu0 %v437_v25  ;;  %v2804_v42 = vld [vmem:[#allocation2 + $0x30] sm:$0xff]  ;;  %v434_v52 = vld [vmem:[#allocation8 + $0x60] sm:$0xff] }
  0x23   :  { %483 = vmatpush.msra.mxu1 %v482_v26  ;;  %v2807_v44 = vld [vmem:[#allocation5 + $0x10] sm:$0xff]  ;;  %v2819_v49 = vld [vmem:[#allocation2 + $0x38] sm:$0xff]  ;;  %v479_v53 = vld [vmem:[#allocation10 + $0x60] sm:$0xff] }
  0x24   :  { %439 = vmatpush.msra.mxu0 %v436_v27  ;;  %v435_v50 = vld [vmem:[#allocation8 + $0x68] sm:$0xff]  ;;  %v433_v54 = vld [vmem:[#allocation8 + $0x58] sm:$0xff]  ;;  %v432_v57 = vld [vmem:[#allocation8 + $0x50] sm:$0xff] }
  0x25   :  { %v2389_v8 = vpop.eup %2388  ;;  %484 = vmatpush.msra.mxu1 %v481_v30  ;;  %v480_v51 = vld [vmem:[#allocation10 + $0x68] sm:$0xff]  ;;  %v478_v55 = vld [vmem:[#allocation10 + $0x58] sm:$0xff]  ;;  %v477_v58 = vld [vmem:[#allocation10 + $0x50] sm:$0xff] }
  0x26   :  { %v160_v9 = vmul.f32 128.0, %v2389_v8  ;;  %vm164_vm0 = vweird.f32 %v2389_v8  ;;  %440 = vmatpush.msra.mxu0 %v435_v50  ;;  %v2822_v56 = vld [vmem:[#allocation11 + $0x78] sm:$0xff]  ;;  %v2825_v59 = vld [vmem:[#allocation11 + $0x70] sm:$0xff]  ;;  %v431_v60 = vld [vmem:[#allocation8 + $0x48] sm:$0xff] }
  0x27   :  { %147 = vadd.xlane.f32.xlu1 %v137_v4  ;;  %334 = vadd.xlane.f32.xlu2 %v329_v5  ;;  %v476_v61 = vld [vmem:[#allocation10 + $0x48] sm:$0xff]  ;;  %v430_v63 = vld [vmem:[#allocation8 + $0x40] sm:$0xff]  ;;  %v2837_v7 = vld [vmem:[#allocation11 + $0x50] sm:$0xff] }
  0x28   :  { %145 = vadd.xlane.f32.xlu0 %v136_v3  ;;  %v161_v10 = vsub.f32 1.0, %v160_v9  ;;  %485 = vmatpush.msra.mxu1 %v480_v51  ;;  %v2828_v62 = vld [vmem:[#allocation11 + $0x68] sm:$0xff]  ;;  %v422_v27 = vld [vmem:[#allocation8] sm:$0xff]  ;;  %v2858_v30 = vld [vmem:[#allocation11 + $0x18] sm:$0xff] }
  0x29   :  { %441 = vmatpush.msra.mxu0 %v434_v52  ;;  %2268 = vmatpush.msra.mxu2 %v2822_v56  ;;  %v472_v9 = vld [vmem:[#allocation10 + $0x28] sm:$0xff] }
  0x2a   :  { %v162_v11 = vmul.f32 %v2389_v8, %v161_v10  ;;  %486 = vmatpush.msra.mxu1 %v479_v53  ;;  %v2840_v10 = vld [vmem:[#allocation11 + $0x48] sm:$0xff] }
  0x2b   :  { %442 = vmatpush.msra.mxu0 %v433_v54  ;;  %2269 = vmatpush.msra.mxu2 %v2825_v59  ;;  %v468_v25 = vld [vmem:[#allocation10 + $0x8] sm:$0xff] }
  0x2c   :  { %v163_v12 = vadd.f32 %v2389_v8, %v162_v11  ;;  %487 = vmatpush.msra.mxu1 %v478_v55  ;;  %v426_v11 = vld [vmem:[#allocation8 + $0x20] sm:$0xff]  ;;  %v2852_v26 = vld [vmem:[#allocation11 + $0x28] sm:$0xff] }
  0x2d   :  { %443 = vmatpush.msra.mxu0 %v432_v57  ;;  %2270 = vmatpush.msra.mxu2 %v2828_v62 }
  0x2e   :  { %v2773_v13 = vsel %vm164_vm0, %v2389_v8, %v163_v12  ;;  %488 = vmatpush.msra.mxu1 %v477_v58  ;;  %v427_v8 = vld [vmem:[#allocation8 + $0x28] sm:$0xff]  ;;  %v471_v12 = vld [vmem:[#allocation10 + $0x20] sm:$0xff] }
  0x2f   :  { %151 = vadd.xlane.f32.xlu1 %v139_v6  ;;  %444 = vmatpush.msra.mxu0 %v431_v60 }
  0x30   :  { %489 = vmatpush.msra.mxu1 %v476_v61 }
  0x31   :  { %445 = vmatpush.msra.mxu0 %v430_v63 }
  0x92   :  { %v333_v14 = vpop.xlane.xlu1 %332  ;;  %v150_v18 = vpop.xlane.xlu2 %149 }
  0x93   :  { %v144_v15 = vpop.xlane.xlu0 %143  ;;  %v340_v16 = vmul.f32 %v333_v14, %v2773_v13  ;;  %v169_v21 = vmul.f32 %v2773_v13, %v150_v18  ;;  %v2843_v14 = vld [vmem:[#allocation11 + $0x40] sm:$0xff]  ;;  %v424_v18 = vld [vmem:[#allocation8 + $0x10] sm:$0xff] }
  0x94   :  { %v166_v17 = vmul.f32 %v2773_v13, %v144_v15  ;;  %v425_v15 = vld [vmem:[#allocation8 + $0x18] sm:$0xff] }
  0x95   :  { %v2777_v19 = vsub.f32 %v328_v0, %v340_v16  ;;  %v2786_v24 = vsub.f32 %v138_v2, %v169_v21  ;;  %v475_v0 = vld [vmem:[#allocation10 + $0x40] sm:$0xff]  ;;  %v429_v2 = vld [vmem:[#allocation8 + $0x38] sm:$0xff]  ;;  %v469_v21 = vld [vmem:[#allocation10 + $0x10] sm:$0xff] }
  0x96   :  { %v2779_v20 = vsub.f32 %v135_v1, %v166_v17  ;;  %v2831_v1 = vld [vmem:[#allocation11 + $0x60] sm:$0xff]  ;;  %490 = vmatpush.msra.mxu1 %v475_v0  ;;  %446 = vmatpush.msra.mxu0 %v429_v2  ;;  %v470_v16 = vld [vmem:[#allocation10 + $0x18] sm:$0xff] }
  0x97   :  { %v348_v22 = vmul.f32 %v2777_v19, %v2777_v19  ;;  %v185_v33 = vmul.f32 %v2786_v24, %v2786_v24  ;;  %2271 = vmatpush.msra.mxu2 %v2831_v1  ;;  %v2846_v17 = vld [vmem:[#allocation11 + $0x38] sm:$0xff] }
  0x98   :  { %v182_v23 = vmul.f32 %v2779_v20, %v2779_v20 }
  0x99   :  { %352 = vadd.xlane.f32.xlu1 %v348_v22  ;;  %v2849_v22 = vld [vmem:[#allocation11 + $0x30] sm:$0xff] }
  0x9a   :  { %190 = vadd.xlane.f32.xlu0 %v182_v23  ;;  %v148_v29 = vpop.xlane.xlu1 %147  ;;  %v335_v39 = vpop.xlane.xlu2 %334  ;;  %v423_v23 = vld [vmem:[#allocation8 + $0x8] sm:$0xff] }
  0x9b   :  { %v146_v28 = vpop.xlane.xlu0 %145  ;;  %v168_v34 = vmul.f32 %v2773_v13, %v148_v29  ;;  %v341_v43 = vmul.f32 %v335_v39, %v2773_v13  ;;  %v2855_v29 = vld [vmem:[#allocation11 + $0x20] sm:$0xff] }
  0x9c   :  { %v167_v31 = vmul.f32 %v2773_v13, %v146_v28  ;;  %v467_v28 = vld [vmem:[#allocation10] sm:$0xff] }
  0x9d   :  { %v2799_v37 = vsub.f32 %v137_v4, %v168_v34  ;;  %v2813_v46 = vsub.f32 %v329_v5, %v341_v43  ;;  %v2834_v4 = vld [vmem:[#allocation11 + $0x58] sm:$0xff]  ;;  %v428_v5 = vld [vmem:[#allocation8 + $0x30] sm:$0xff]  ;;  %v2874_v43 = vld [vmem:[#allocation11] sm:$0xff] }
  0x9e   :  { %v2789_v32 = vsub.f32 %v136_v3, %v167_v31  ;;  %v474_v3 = vld [vmem:[#allocation10 + $0x38] sm:$0xff]  ;;  %2272 = vmatpush.msra.mxu2 %v2834_v4  ;;  %447 = vmatpush.msra.mxu0 %v428_v5 }
  0x9f   :  { %v184_v40 = vmul.f32 %v2799_v37, %v2799_v37  ;;  %v349_v48 = vmul.f32 %v2813_v46, %v2813_v46  ;;  %491 = vmatpush.msra.mxu1 %v474_v3 }
  0xa0   :  { %v183_v36 = vmul.f32 %v2789_v32, %v2789_v32  ;;  %2273 = vmatpush.msra.mxu2 %v2837_v7  ;;  %448 = vmatpush.msra.mxu0 %v427_v8 }
  0xa1   :  { %196 = vadd.xlane.f32.xlu1 %v185_v33 }
  0xa2   :  { %153 = vadd.xlane.f32.xlu0 %v2794_v35  ;;  %192 = vadd.xlane.f32.xlu2 %v183_v36  ;;  %v152_v38 = vpop.xlane.xlu1 %151 }
  0xa3   :  { %v170_v41 = vmul.f32 %v2773_v13, %v152_v38  ;;  %2274 = vmatpush.msra.mxu2 %v2840_v10  ;;  %449 = vmatpush.msra.mxu0 %v426_v11  ;;  %v2864_v38 = vld [vmem:[#allocation11 + $0x10] sm:$0xff] }
  0xa5   :  { %v2810_v45 = vsub.f32 %v139_v6, %v170_v41  ;;  %v473_v6 = vld [vmem:[#allocation10 + $0x30] sm:$0xff]  ;;  %2275 = vmatpush.msra.mxu2 %v2843_v14  ;;  %450 = vmatpush.msra.mxu0 %v425_v15  ;;  %v2870_v41 = vld [vmem:[#allocation11 + $0x8] sm:$0xff] }
  0xa6   :  { %492 = vmatpush.msra.mxu1 %v473_v6 }
  0xa7   :  { %v186_v47 = vmul.f32 %v2810_v45, %v2810_v45  ;;  %2276 = vmatpush.msra.mxu2 %v2846_v17  ;;  %451 = vmatpush.msra.mxu0 %v424_v18 }
  0xa8   :  { %493 = vmatpush.msra.mxu1 %v472_v9 }
  0xa9   :  { %155 = vadd.xlane.f32.xlu1 %v2804_v42  ;;  %2277 = vmatpush.msra.mxu2 %v2849_v22 }
  0xaa   :  { %194 = vadd.xlane.f32.xlu0 %v184_v40  ;;  %336 = vadd.xlane.f32.xlu2 %v2807_v44 }
  0xab   :  { %494 = vmatpush.msra.mxu1 %v471_v12  ;;  %452 = vmatpush.msra.mxu0 %v423_v23 }
  0xac   :  { %2278 = vmatpush.msra.mxu2 %v2852_v26 }
  0xad   :  { %495 = vmatpush.msra.mxu1 %v470_v16  ;;  %453 = vmatpush.msra.mxu0 %v422_v27 }
  0xae   :  { %2279 = vmatpush.msra.mxu2 %v2855_v29 }
  0xaf   :  { %496 = vmatpush.msra.mxu1 %v469_v21  ;;  %552 = vmatpush.msrb.mxu0 %v2822_v56 }
  0xb0   :  { %2280 = vmatpush.msra.mxu2 %v2858_v30 }
  0xb1   :  { %497 = vmatpush.msra.mxu1 %v468_v25  ;;  %553 = vmatpush.msrb.mxu0 %v2825_v59 }
  0xb2   :  { %198 = vadd.xlane.f32.xlu0 %v186_v47  ;;  %354 = vadd.xlane.f32.xlu2 %v349_v48 }
  0xb3   :  { %498 = vmatpush.msra.mxu1 %v467_v28  ;;  %2281 = vmatpush.msra.mxu2 %v2864_v38  ;;  %v2939_v28 = vld [vmem:[#allocation5 + $0x18] sm:$0xff] }
  0xb4   :  { %554 = vmatpush.msrb.mxu0 %v2828_v62  ;;  %v134_v62 = vld [vmem:[#allocation7] sm:$0xf] }
  0xb5   :  { %2282 = vmatpush.msra.mxu2 %v2870_v41  ;;  %v2911_v11 = vperm.slane %v134_v62, 2  ;;  %v2933_v25 = vperm.slane %v134_v62, 3 }
  0xb6   :  { %555 = vmatpush.msrb.mxu0 %v2831_v1 }
  0xb7   :  { %2283 = vmatpush.msra.mxu2 %v2874_v43 }
  0xb8   :  { %556 = vmatpush.msrb.mxu0 %v2834_v4 }
  0xba   :  { %157 = vadd.xlane.f32.xlu0 %v2819_v49  ;;  %557 = vmatpush.msrb.mxu0 %v2837_v7  ;;  %v2905_v7 = vperm.slane %v134_v62, 0 }
  0xbc   :  { %558 = vmatpush.msrb.mxu0 %v2840_v10  ;;  %v2909_v10 = vperm.slane %v134_v62, 1 }
  0xbe   :  { %559 = vmatpush.msrb.mxu0 %v2843_v14 }
  0xc0   :  { %560 = vmatpush.msrb.mxu0 %v2846_v17 }
  0xc2   :  { %561 = vmatpush.msrb.mxu0 %v2849_v22 }
  0xc4   :  { %562 = vmatpush.msrb.mxu0 %v2852_v26 }
  0xc6   :  { %563 = vmatpush.msrb.mxu0 %v2855_v29 }
  0xc8   :  { %564 = vmatpush.msrb.mxu0 %v2858_v30 }
  0xca   :  { %565 = vmatpush.msrb.mxu0 %v2864_v38 }
  0xcc   :  { %566 = vmatpush.msrb.mxu0 %v2870_v41 }
  0xce   :  { %567 = vmatpush.msrb.mxu0 %v2874_v43 }
 0x10c   :  { %v353_v31 = vpop.xlane.xlu1 %352 }
 0x10d   :  { %v191_v33 = vpop.xlane.xlu0 %190  ;;  %v360_v34 = vmul.f32 %v353_v31, %v2773_v13 }
 0x10e   :  { %v206_v36 = vmul.f32 %v191_v33, %v2773_v13 }
 0x10f   :  { %v364_v39 = vadd.f32 1e-05, %v360_v34 }
 0x110   :  { %v2867_v40 = vadd.f32 1e-05, %v206_v36 }
 0x111   :  { %2390 = vrsqrt.f32 %v364_v39  ;;  %vm374_vm1 = vweird.f32 %v364_v39 }
 0x112   :  { %2392 = vrsqrt.f32 %v2867_v40  ;;  %vm228_vm5 = vweird.f32 %v2867_v40 }
 0x114   :  { %v197_v47 = vpop.xlane.xlu1 %196 }
 0x115   :  { %v154_v48 = vpop.xlane.xlu0 %153  ;;  %v209_v50 = vmul.f32 %v197_v47, %v2773_v13  ;;  %v193_v51 = vpop.xlane.xlu2 %192 }
 0x116   :  { %v171_v52 = vmul.f32 %v2773_v13, %v154_v48  ;;  %v207_v53 = vmul.f32 %v193_v51, %v2773_v13 }
 0x117   :  { %v2391_v54 = vpop.eup %2390  ;;  %v2884_v55 = vadd.f32 1e-05, %v209_v50 }
 0x118   :  { %v2887_v56 = vsub.f32 %v2794_v35, %v171_v52  ;;  %v2890_v57 = vpop.eup %2392  ;;  %v369_v58 = vmul.f32 %v2391_v54, %v364_v39  ;;  %v2892_v59 = vadd.f32 1e-05, %v207_v53  ;;  %vm375_vm2 = vweird.f32 %v2391_v54 }
 0x119   :  { %v223_v60 = vmul.f32 %v2890_v57, %v2867_v40  ;;  %2394 = vrsqrt.f32 %v2884_v55  ;;  %vm2917_vm3 = vmor %vm374_vm1, %vm375_vm2  ;;  %vm229_vm4 = vweird.f32 %v2890_v57  ;;  %vm258_vm7 = vweird.f32 %v2884_v55 }
 0x11a   :  { %v370_v61 = vmul.f32 %v2391_v54, %v369_v58  ;;  %2396 = vrsqrt.f32 %v2892_v59  ;;  %v187_v35 = vmul.f32 %v2887_v56, %v2887_v56  ;;  %vm230_vm6 = vmor %vm228_vm5, %vm229_vm4  ;;  %vm238_vm9 = vweird.f32 %v2892_v59 }
 0x11b   :  { %v224_v63 = vmul.f32 %v2890_v57, %v223_v60 }
 0x11c   :  { %v371_v0 = vmul.f32 0.5, %v370_v61  ;;  %200 = vadd.xlane.f32.xlu2 %v187_v35  ;;  %v156_v1 = vpop.xlane.xlu1 %155 }
 0x11d   :  { %v195_v2 = vpop.xlane.xlu0 %194  ;;  %v225_v3 = vmul.f32 0.5, %v224_v63  ;;  %v172_v4 = vmul.f32 %v2773_v13, %v156_v1  ;;  %v337_v5 = vpop.xlane.xlu2 %336 }
 0x11e   :  { %v208_v6 = vmul.f32 %v195_v2, %v2773_v13  ;;  %v372_v8 = vsub.f32 1.5, %v371_v0  ;;  %v342_v9 = vmul.f32 %v337_v5, %v2773_v13 }
 0x11f   :  { %v2913_v12 = vpop.eup %2394  ;;  %v226_v15 = vsub.f32 1.5, %v225_v3  ;;  %v2923_v16 = vsub.f32 %v2804_v42, %v172_v4 }
 0x120   :  { %v2925_v17 = vadd.f32 1e-05, %v208_v6  ;;  %v2397_v18 = vpop.eup %2396  ;;  %v373_v21 = vmul.f32 %v2391_v54, %v372_v8  ;;  %v253_v22 = vmul.f32 %v2913_v12, %v2884_v55  ;;  %v2931_v23 = vsub.f32 %v2807_v44, %v342_v9 }
 0x121   :  { %v227_v27 = vmul.f32 %v2890_v57, %v226_v15  ;;  %v233_v42 = vmul.f32 %v2397_v18, %v2892_v59  ;;  %v188_v31 = vmul.f32 %v2923_v16, %v2923_v16  ;;  %vm259_vm8 = vweird.f32 %v2913_v12 }
 0x122   :  { %2398 = vrsqrt.f32 %v2925_v17  ;;  %v377_v26 = vsel %vm2917_vm3, %v2391_v54, %v373_v21  ;;  %v254_v44 = vmul.f32 %v2913_v12, %v253_v22  ;;  %v350_v34 = vmul.f32 %v2931_v23, %v2931_v23  ;;  %vm2968_vm11 = vmor %vm258_vm7, %vm259_vm8 }
 0x123   :  { %v234_v33 = vmul.f32 %v2397_v18, %v233_v42  ;;  %v408_v36 = vmul.f32 %v377_v26, %v2777_v19  ;;  %v231_v29 = vsel %vm230_vm6, %v2890_v57, %v227_v27  ;;  %202 = vadd.xlane.f32.xlu0 %v188_v31  ;;  %vm239_vm10 = vweird.f32 %v2397_v18 }
 0x124   :  { %v255_v39 = vmul.f32 0.5, %v254_v44  ;;  %338 = vadd.xlane.f32.xlu2 %v2939_v28  ;;  %v302_v47 = vmul.f32 %v231_v29, %v2779_v20  ;;  %356 = vadd.xlane.f32.xlu1 %v350_v34  ;;  %vm2980_vm12 = vmor %vm238_vm9, %vm239_vm10  ;;  %vm248_vm13 = vweird.f32 %v2925_v17 }
 0x125   :  { %v199_v40 = vpop.xlane.xlu0 %198  ;;  %v235_v48 = vmul.f32 0.5, %v234_v33  ;;  %v355_v50 = vpop.xlane.xlu2 %354  ;;  %v413_v51 = vmul.f32 %v2911_v11, %v408_v36 }
 0x126   :  { %v210_v19 = vmul.f32 %v199_v40, %v2773_v13  ;;  %v256_v30 = vsub.f32 1.5, %v255_v39  ;;  %v361_v52 = vmul.f32 %v355_v50, %v2773_v13  ;;  %v311_v53 = vmul.f32 %v2905_v7, %v302_v47 }
 0x127   :  { %v236_v57 = vsub.f32 1.5, %v235_v48  ;;  %v2973_v60 = vadd.f32 %v2933_v25, %v413_v51 }
 0x128   :  { %v2399_v54 = vpop.eup %2398  ;;  %v218_v58 = vadd.f32 1e-05, %v210_v19  ;;  %v257_v38 = vmul.f32 %v2913_v12, %v256_v30  ;;  %v365_v35 = vadd.f32 1e-05, %v361_v52  ;;  %v2987_v63 = vadd.f32 %v2909_v10, %v311_v53 }
 0x129   :  { %v243_v55 = vmul.f32 %v2399_v54, %v2925_v17  ;;  %v237_v62 = vmul.f32 %v2397_v18, %v236_v57  ;;  %454 = vmatmul.f32.vlgmr.msra.gmra.mxu0 %v2973_v60  ;;  %vm249_vm14 = vweird.f32 %v2399_v54 }
 0x12a   :  { %2400 = vrsqrt.f32 %v218_v58  ;;  %v261_v59 = vsel %vm2968_vm11, %v2913_v12, %v257_v38  ;;  %499 = vmatmul.f32.vlgmr.msra.gmra.mxu1 %v2987_v63  ;;  %vm3011_vm15 = vmor %vm248_vm13, %vm249_vm14  ;;  %vm384_vm0 = vweird.f32 %v365_v35  ;;  %vm268_vm2 = vweird.f32 %v218_v58 }
 0x12b   :  { %v244_v41 = vmul.f32 %v2399_v54, %v243_v55  ;;  %2402 = vrsqrt.f32 %v365_v35  ;;  %v241_v0 = vsel %vm2980_vm12, %v2397_v18, %v237_v62  ;;  %v305_v1 = vmul.f32 %v261_v59, %v2786_v24 }
 0x12c   :  { %v303_v4 = vmul.f32 %v241_v0, %v2789_v32 }
 0x12d   :  { %v245_v2 = vmul.f32 0.5, %v244_v41  ;;  %v158_v3 = vpop.xlane.xlu0 %157  ;;  %v314_v6 = vmul.f32 %v2905_v7, %v305_v1 }
 0x12e   :  { %v173_v5 = vmul.f32 %v2773_v13, %v158_v3  ;;  %v312_v9 = vmul.f32 %v2905_v7, %v303_v4 }
 0x12f   :  { %v246_v8 = vsub.f32 1.5, %v245_v2  ;;  %v323_v14 = vadd.f32 %v2909_v10, %v314_v6 }
 0x130   :  { %v2401_v12 = vpop.eup %2400  ;;  %v3002_v43 = vsub.f32 %v2819_v49, %v173_v5  ;;  %v3007_v32 = vadd.f32 %v2909_v10, %v312_v9 }
 0x131   :  { %v2403_v15 = vpop.eup %2402  ;;  %v263_v24 = vmul.f32 %v2401_v12, %v218_v58  ;;  %580 = vmatmul.f32.vlgmr.msra.gmra.mxu2 %v323_v14  ;;  %v247_v22 = vmul.f32 %v2399_v54, %v246_v8  ;;  %vm269_vm3 = vweird.f32 %v2401_v12 }
 0x132   :  { %v379_v18 = vmul.f32 %v2403_v15, %v365_v35  ;;  %v189_v21 = vmul.f32 %v3002_v43, %v3002_v43  ;;  %502 = vmatmul.f32.gmra.mxu1 %v3007_v32  ;;  %vm385_vm1 = vweird.f32 %v2403_v15  ;;  %vm270_vm5 = vmor %vm268_vm2, %vm269_vm3 }
 0x133   :  { %v264_v27 = vmul.f32 %v2401_v12, %v263_v24  ;;  %v251_v31 = vsel %vm3011_vm15, %v2399_v54, %v247_v22  ;;  %vm386_vm4 = vmor %vm384_vm0, %vm385_vm1  ;;  %vm605_vm1 = vcmask 261120  }
 0x134   :  { %v380_v42 = vmul.f32 %v2403_v15, %v379_v18  ;;  %204 = vadd.xlane.f32.xlu1 %v189_v21  ;;  %v304_v29 = vmul.f32 %v251_v31, %v2799_v37 }
 0x135   :  { %v265_v17 = vmul.f32 0.5, %v264_v27 }
 0x136   :  { %v381_v26 = vmul.f32 0.5, %v380_v42  ;;  %v313_v47 = vmul.f32 %v2905_v7, %v304_v29 }
 0x137   :  { %v266_v44 = vsub.f32 1.5, %v265_v17 }
 0x138   :  { %v382_v33 = vsub.f32 1.5, %v381_v26  ;;  %v3026_v30 = vadd.f32 %v2909_v10, %v313_v47 }
 0x139   :  { %v267_v36 = vmul.f32 %v2401_v12, %v266_v44 }
 0x13a   :  { %v383_v34 = vmul.f32 %v2403_v15, %v382_v33  ;;  %505 = vmatmul.f32.gmra.mxu1 %v2973_v60 }
 0x13b   :  { %v271_v48 = vsel %vm270_vm5, %v2401_v12, %v267_v36 }
 0x13c   :  { %v387_v39 = vsel %vm386_vm4, %v2403_v15, %v383_v34  ;;  %v306_v51 = vmul.f32 %v271_v48, %v2810_v45 }
 0x13d   :  { %v409_v40 = vmul.f32 %v387_v39, %v2813_v46 }
 0x13e   :  { %v315_v37 = vmul.f32 %v2905_v7, %v306_v51 }
 0x13f   :  { %v414_v50 = vmul.f32 %v2911_v11, %v409_v40 }
 0x140   :  { %v324_v46 = vadd.f32 %v2909_v10, %v315_v37 }
 0x141   :  { %v419_v19 = vadd.f32 %v2933_v25, %v414_v50 }
 0x142   :  { %508 = vmatmul.f32.gmra.mxu1 %v3026_v30 }
 0x143   :  { %457 = vmatmul.f32.gmra.mxu0 %v419_v19  ;;  %583 = vmatmul.f32.gmra.mxu2 %v419_v19 }
 0x14a   :  { %511 = vmatmul.f32.gmra.mxu1 %v323_v14 }
 0x14b   :  { %586 = vmatmul.f32.gmra.mxu2 %v324_v46 }
 0x152   :  { %514 = vmatmul.f32.gmra.mxu1 %v419_v19 }
 0x15a   :  { %517 = vmatmul.f32.gmra.mxu1 %v324_v46 }
 0x18f   :  { %v201_v52 = vpop.xlane.xlu2 %200 }
 0x190   :  { %v211_v53 = vmul.f32 %v201_v52, %v2773_v13 }
 0x192   :  { %v219_v54 = vadd.f32 1e-05, %v211_v53 }
 0x194   :  { %2404 = vrsqrt.f32 %v219_v54  ;;  %vm278_vm7 = vweird.f32 %v219_v54 }
 0x196   :  { %v203_v20 = vpop.xlane.xlu0 %202 }
 0x197   :  { %v339_v45 = vpop.xlane.xlu2 %338  ;;  %v357_v57 = vpop.xlane.xlu1 %356  ;;  %v212_v38 = vmul.f32 %v203_v20, %v2773_v13 }
 0x198   :  { %v343_v58 = vmul.f32 %v339_v45, %v2773_v13  ;;  %v362_v61 = vmul.f32 %v357_v57, %v2773_v13 }
 0x199   :  { %v220_v62 = vadd.f32 1e-05, %v212_v38 }
 0x19a   :  { %v2405_v55 = vpop.eup %2404  ;;  %v3036_v35 = vsub.f32 %v2939_v28, %v343_v58  ;;  %v366_v59 = vadd.f32 1e-05, %v362_v61 }
 0x19b   :  { %v273_v41 = vmul.f32 %v2405_v55, %v219_v54  ;;  %2406 = vrsqrt.f32 %v220_v62  ;;  %vm279_vm6 = vweird.f32 %v2405_v55  ;;  %vm288_vm11 = vweird.f32 %v220_v62 }
 0x19c   :  { %v351_v0 = vmul.f32 %v3036_v35, %v3036_v35  ;;  %2408 = vrsqrt.f32 %v366_v59  ;;  %vm280_vm8 = vmor %vm278_vm7, %vm279_vm6  ;;  %vm394_vm9 = vweird.f32 %v366_v59  ;;  %vm738_vm6 = vcmask 195584  }
 0x19d   :  { %v274_v1 = vmul.f32 %v2405_v55, %v273_v41 }
 0x19e   :  { %358 = vadd.xlane.f32.xlu2 %v351_v0 }
 0x19f   :  { %v275_v2 = vmul.f32 0.5, %v274_v1 }
 0x1a1   :  { %v276_v3 = vsub.f32 1.5, %v275_v2  ;;  %v2407_v4 = vpop.eup %2406 }
 0x1a2   :  { %v2409_v5 = vpop.eup %2408  ;;  %v283_v8 = vmul.f32 %v2407_v4, %v220_v62  ;;  %vm289_vm12 = vweird.f32 %v2407_v4 }
 0x1a3   :  { %v277_v6 = vmul.f32 %v2405_v55, %v276_v3  ;;  %v389_v28 = vmul.f32 %v2409_v5, %v366_v59  ;;  %vm395_vm10 = vweird.f32 %v2409_v5  ;;  %vm290_vm14 = vmor %vm288_vm11, %vm289_vm12 }
 0x1a4   :  { %v284_v9 = vmul.f32 %v2407_v4, %v283_v8  ;;  %vm396_vm13 = vmor %vm394_vm9, %vm395_vm10 }
 0x1a5   :  { %v281_v12 = vsel %vm280_vm8, %v2405_v55, %v277_v6  ;;  %v390_v14 = vmul.f32 %v2409_v5, %v389_v28 }
 0x1a6   :  { %v307_v24 = vmul.f32 %v281_v12, %v2887_v56  ;;  %v285_v18 = vmul.f32 0.5, %v284_v9  ;;  %v3064_v54 = vpop.f32.mrf.mxu0 }
 0x1a7   :  { %v205_v15 = vpop.xlane.xlu1 %204  ;;  %v391_v22 = vmul.f32 0.5, %v390_v14  ;;  %v3042_v27 = vpop.f32.mrf.mxu1 }
 0x1a8   :  { %v213_v21 = vmul.f32 %v205_v15, %v2773_v13  ;;  %v316_v49 = vmul.f32 %v2905_v7, %v307_v24  ;;  %v286_v42 = vsub.f32 1.5, %v285_v18 }
 0x1a9   :  { %v392_v26 = vsub.f32 1.5, %v391_v22 }
 0x1aa   :  { %v221_v17 = vadd.f32 1e-05, %v213_v21  ;;  %v325_v44 = vadd.f32 %v2909_v10, %v316_v49  ;;  %v287_v31 = vmul.f32 %v2407_v4, %v286_v42 }
 0x1ab   :  { %v393_v56 = vmul.f32 %v2409_v5, %v392_v26 }
 0x1ac   :  { %2410 = vrsqrt.f32 %v221_v17  ;;  %520 = vmatmul.f32.gmra.mxu1 %v325_v44  ;;  %589 = vmatmul.f32.gmra.mxu2 %v325_v44  ;;  %v291_v29 = vsel %vm290_vm14, %v2407_v4, %v287_v31  ;;  %vm298_vm15 = vweird.f32 %v221_v17 }
 0x1ad   :  { %v397_v33 = vsel %vm396_vm13, %v2409_v5, %v393_v56  ;;  %v308_v50 = vmul.f32 %v291_v29, %v2923_v16 }
 0x1ae   :  { %v410_v34 = vmul.f32 %v397_v33, %v2931_v23 }
 0x1af   :  { %v3047_v36 = vpop.f32.mrf.mxu1  ;;  %v317_v23 = vmul.f32 %v2905_v7, %v308_v50 }
 0x1b0   :  { %931 = vrot.lane.b32.xlu1 %v3047_v36, %s2690_s4  ;;  %v415_v40 = vmul.f32 %v2911_v11, %v410_v34 }
 0x1b1   :  { %v326_v52 = vadd.f32 %v2909_v10, %v317_v23 }
 0x1b2   :  { %v2411_v39 = vpop.eup %2410  ;;  %v420_v48 = vadd.f32 %v2933_v25, %v415_v40 }
 0x1b3   :  { %v293_v47 = vmul.f32 %v2411_v39, %v221_v17  ;;  %vm299_vm0 = vweird.f32 %v2411_v39 }
 0x1b4   :  { %460 = vmatmul.f32.gmra.mxu0 %v420_v48  ;;  %523 = vmatmul.f32.gmra.mxu1 %v420_v48  ;;  %vm300_vm2 = vmor %vm298_vm15, %vm299_vm0  ;;  %v3066_v45 = vpop.f32.mrf.mxu2 }
 0x1b5   :  { %v294_v19 = vmul.f32 %v2411_v39, %v293_v47  ;;  %592 = vmatmul.f32.gmra.mxu2 %v420_v48 }
 0x1b6   :  { %929 = vrot.lane.b32.xlu2 %v3042_v27, %s2690_s4 }
 0x1b7   :  { %v295_v51 = vmul.f32 0.5, %v294_v19  ;;  %v3057_v46 = vpop.f32.mrf.mxu1 }
 0x1b8   :  { %933 = vrot.lane.b32.xlu0 %v3057_v46, %s2690_s4  ;;  %2188 = vmatpush.xpose.msk.msra.mxu3 %vm605_vm1, %v3057_v46 }
 0x1b9   :  { %v296_v37 = vsub.f32 1.5, %v295_v51 }
 0x1bb   :  { %v297_v16 = vmul.f32 %v2411_v39, %v296_v37 }
 0x1bc   :  { %526 = vmatmul.f32.gmra.mxu1 %v326_v52  ;;  %2189 = vmatpush.xpose.msk.msra.mxu3 %vm605_vm1, %v3047_v36 }
 0x1bd   :  { %v301_v53 = vsel %vm300_vm2, %v2411_v39, %v297_v16  ;;  %595 = vmatmul.f32.gmra.mxu2 %v326_v52 }
 0x1be   :  { %v309_v20 = vmul.f32 %v301_v53, %v3002_v43  ;;  %927 = vrot.lane.b32.xlu2 %v3064_v54, %s2690_s4 }
 0x1bf   :  { %v3074_v58 = vpop.f32.mrf.mxu1 }
 0x1c0   :  { %v318_v57 = vmul.f32 %v2905_v7, %v309_v20  ;;  %2190 = vmatpush.xpose.msk.msra.mxu3 %vm605_vm1, %v3042_v27 }
 0x1c2   :  { %v327_v38 = vadd.f32 %v2909_v10, %v318_v57  ;;  %v3095_v10 = vpop.f32.mrf.mxu0 }
 0x1c3   :  { %2191 = vmatmul.msk.f32.vlgmr.msra.gmra.mxu3 %vm605_vm1, %v3064_v54 }
 0x1c4   :  { %529 = vmatmul.f32.gmra.mxu1 %v327_v38 }
 0x1c5   :  { %598 = vmatmul.f32.gmra.mxu2 %v327_v38 }
 0x1c6   :  { %v3081_v61 = vpop.f32.mrf.mxu2 }
 0x1c7   :  { %874 = vmatpush.msra.mxu0 %v3081_v61  ;;  %v3084_v43 = vpop.f32.mrf.mxu1 }
 0x1c9   :  { %875 = vmatpush.msra.mxu0 %v3066_v45 }
 0x1cf   :  { %v3087_v7 = vpop.f32.mrf.mxu1 }
 0x1d0   :  { %2192 = vmatpush.xpose.msk.msrb.mxu3 %vm605_vm1, %v3087_v7 }
 0x1d4   :  { %2193 = vmatpush.xpose.msk.msrb.mxu3 %vm605_vm1, %v3084_v43 }
 0x1d7   :  { %v3100_v2 = vpop.f32.mrf.mxu1 }
 0x1d8   :  { %2194 = vmatpush.xpose.msk.msrb.mxu3 %vm605_vm1, %v3074_v58 }
 0x1db   :  { %2195 = vmatmul.msk.f32.vlgmr.msrb.gmra.mxu3 %vm605_vm1, %v3095_v10 }
 0x211   :  { %v359_v55 = vpop.xlane.xlu2 %358 }
 0x212   :  { %v363_v62 = vmul.f32 %v359_v55, %v2773_v13 }
 0x214   :  { %v367_v41 = vadd.f32 1e-05, %v363_v62 }
 0x216   :  { %2412 = vrsqrt.f32 %v367_v41  ;;  %vm404_vm4 = vweird.f32 %v367_v41 }
 0x21c   :  { %v2413_v59 = vpop.eup %2412 }
 0x21d   :  { %v399_v0 = vmul.f32 %v2413_v59, %v367_v41  ;;  %vm405_vm3 = vweird.f32 %v2413_v59 }
 0x21e   :  { %vm406_vm5 = vmor %vm404_vm4, %vm405_vm3 }
 0x21f   :  { %v400_v1 = vmul.f32 %v2413_v59, %v399_v0 }
 0x221   :  { %v401_v3 = vmul.f32 0.5, %v400_v1 }
 0x222   :  { %v932_v16 = vpop.permute.xlu1 %931 }
 0x223   :  { %v402_v4 = vsub.f32 1.5, %v401_v3 }
 0x225   :  { %v403_v5 = vmul.f32 %v2413_v59, %v402_v4 }
 0x227   :  { %v407_v6 = vsel %vm406_vm5, %v2413_v59, %v403_v5 }
 0x228   :  { %v411_v8 = vmul.f32 %v407_v6, %v3036_v35 }
 0x229   :  { %v3103_v28 = vpop.f32.mrf.mxu1 }
 0x22a   :  { %v416_v13 = vmul.f32 %v2911_v11, %v411_v8  ;;  %v3152_v17 = vpop.permute.xlu0 %933 }
 0x22c   :  { %v421_v9 = vadd.f32 %v2933_v25, %v416_v13 }
 0x22e   :  { %463 = vmatmul.f32.gmra.mxu0 %v421_v9  ;;  %532 = vmatmul.f32.gmra.mxu1 %v421_v9 }
 0x22f   :  { %601 = vmatmul.f32.gmra.mxu2 %v421_v9 }
 0x231   :  { %v3107_v12 = vpop.f32.mrf.mxu1  ;;  %v3116_v35 = vpop.f32.mrf.mxu0 }
 0x232   :  { %2196 = vmatpush.xpose.msk.msra.mxu3 %vm605_vm1, %v3107_v12 }
 0x236   :  { %568 = vmatmul.f32.vlgmr.msrb.gmra.mxu0 %v2987_v63  ;;  %2197 = vmatpush.xpose.msk.msra.mxu3 %vm605_vm1, %v3103_v28 }
 0x23a   :  { %2198 = vmatpush.xpose.msk.msra.mxu3 %vm605_vm1, %v3100_v2 }
 0x23d   :  { %2199 = vmatmul.msk.f32.vlgmr.msra.gmra.mxu3 %vm605_vm1, %v3116_v35 }
 0x23e   :  { %571 = vmatmul.f32.gmra.mxu0 %v3007_v32  ;;  %v3130_v32 = vpop.f32.mrf.mxu1 }
 0x246   :  { %574 = vmatmul.f32.gmra.mxu0 %v2973_v60  ;;  %v635_v11 = vpop.f32.mrf.mxu3  ;;  %v3132_v60 = vpop.f32.mrf.mxu2 }
 0x247   :  { %v734_v25 = vmul.f32 0.17677669, %v635_v11  ;;  %v3134_v18 = vpop.f32.mrf.mxu1 }
 0x249   :  { %v739_v63 = vsel %vm738_vm6, %v734_v25, -inf }
 0x24a   :  { %740 = vmax.xlane.f32.xlu0 %v739_v63 }
 0x24e   :  { %577 = vmatmul.f32.gmra.mxu0 %v3026_v30  ;;  %v3136_v21 = vpop.f32.mrf.mxu2 }
 0x24f   :  { %v3194_v37 = vpack.i.bf16 %v3132_v60, %v3136_v21 }
 0x256   :  { %v3144_v49 = vpop.f32.mrf.mxu2 }
 0x25e   :  { %969 = vrot.lane.b32.xlu0 %v3087_v7, %s2690_s4  ;;  %v667_v14 = vpop.f32.mrf.mxu3  ;;  %v3156_v26 = vpop.f32.mrf.mxu2 }
 0x25f   :  { %v3126_v15 = vmul.f32 0.17677669, %v667_v14  ;;  %v930_v14 = vpop.permute.xlu2 %929 }
 0x261   :  { %v742_v24 = vsel %vm738_vm6, %v3126_v15, -inf }
 0x262   :  { %743 = vmax.xlane.f32.xlu2 %v742_v24 }
 0x266   :  { %v3158_v40 = vpop.f32.mrf.mxu2 }
 0x267   :  { %v928_v24 = vpop.permute.xlu2 %927 }
 0x2ab   :  { %v3138_v22 = vpop.f32.mrf.mxu0  ;;  %v3140_v30 = vpop.f32.mrf.mxu1 }
 0x2ac   :  { %2200 = vmatpush.xpose.msk.msrb.mxu3 %vm605_vm1, %v3140_v30 }
 0x2b0   :  { %2201 = vmatpush.xpose.msk.msrb.mxu3 %vm605_vm1, %v3134_v18 }
 0x2b2   :  { %v3169_v23 = vpop.f32.mrf.mxu2 }
 0x2b3   :  { %v3148_v42 = vpop.f32.mrf.mxu0 }
 0x2b4   :  { %2202 = vmatpush.xpose.msk.msrb.mxu3 %vm605_vm1, %v3130_v32 }
 0x2b7   :  { %2203 = vmatmul.msk.f32.vlgmr.msrb.gmra.mxu3 %vm605_vm1, %v3138_v22 }
 0x2bb   :  { %v572_v44 = vpop.f32.mrf.mxu0 }
 0x2bd   :  { %v741_v56 = vpop.xlane.xlu0 %740 }
 0x2be   :  { %v751_v31 = vsub.f32 %v734_v25, %v741_v56 }
 0x2c0   :  { %v755_v33 = vmul.f32 1.442695, %v751_v31  ;;  %v699_v34 = vpop.f32.mrf.mxu3 }
 0x2c1   :  { %v736_v29 = vmul.f32 0.17677669, %v699_v34 }
 0x2c2   :  { %2414 = vpow2.f32 %v755_v33 }
 0x2c3   :  { %v575_v39 = vpop.f32.mrf.mxu0  ;;  %v745_v47 = vsel %vm738_vm6, %v736_v29, -inf }
 0x2c4   :  { %851 = vmatpush.msra.mxu3 %v575_v39  ;;  %v3161_v48 = vpack.i.bf16 %v572_v44, %v575_v39  ;;  %746 = vmax.xlane.f32.xlu1 %v745_v47 }
 0x2c6   :  { %852 = vmatpush.msra.mxu3 %v572_v44 }
 0x2c8   :  { %853 = vmatpush.msra.mxu3 %v3148_v42  ;;  %v2415_v50 = vpop.eup %2414 }
 0x2c9   :  { %v763_v19 = vsel %vm738_vm6, %v2415_v50, 0.0 }
 0x2ca   :  { %897 = vmatpush.msrb.mxu3 %v3144_v49  ;;  %764 = vadd.xlane.f32.xlu0 %v763_v19 }
 0x2cb   :  { %v3166_v51 = vpop.f32.mrf.mxu0 }
 0x2cc   :  { %898 = vmatpush.msrb.mxu3 %v3136_v21  ;;  %876 = vmatpush.msra.mxu0 %v3166_v51 }
 0x2ce   :  { %899 = vmatpush.msrb.mxu3 %v3132_v60  ;;  %920 = vmatpush.msrb.mxu0 %v3169_v23 }
 0x2d0   :  { %921 = vmatpush.msrb.mxu0 %v3158_v40  ;;  %v3198_v52 = vpop.permute.xlu0 %969 }
 0x2d2   :  { %922 = vmatpush.msrb.mxu0 %v3156_v26 }
 0x2d5   :  { %v744_v44 = vpop.xlane.xlu2 %743 }
 0x2d6   :  { %v752_v56 = vsub.f32 %v3126_v15, %v744_v44 }
 0x2d8   :  { %v757_v31 = vmul.f32 1.442695, %v752_v56 }
 0x2dd   :  { %967 = vrot.lane.b32.xlu1 %v3084_v43, %s2690_s4 }
 0x2de   :  { %965 = vrot.lane.b32.xlu0 %v3074_v58, %s2690_s4 }
 0x2e6   :  { %1003 = vrot.lane.b32.xlu0 %v3103_v28, %s2690_s4 }
 0x2ee   :  { %999 = vrot.lane.b32.xlu0 %v3116_v35, %s2690_s4 }
 0x2f6   :  { %1041 = vrot.lane.b32.xlu0 %v3140_v30, %s2690_s4 }
 0x2fe   :  { %1039 = vrot.lane.b32.xlu0 %v3134_v18, %s2690_s4 }
 0x306   :  { %1037 = vrot.lane.b32.xlu0 %v3130_v32, %s2690_s4 }
 0x30e   :  { %1035 = vrot.lane.b32.xlu0 %v3138_v22, %s2690_s4 }
 0x316   :  { %2309 = vrot.lane.b32.xlu0 %v3194_v37, %s2690_s4 }
 0x337   :  { %v747_v53 = vpop.xlane.xlu1 %746 }
 0x338   :  { %v753_v20 = vsub.f32 %v736_v29, %v747_v53 }
 0x33a   :  { %v731_v57 = vpop.f32.mrf.mxu3  ;;  %v759_v38 = vmul.f32 1.442695, %v753_v20 }
 0x33b   :  { %v737_v55 = vmul.f32 0.17677669, %v731_v57 }
 0x33c   :  { %2416 = vpow2.f32 %v759_v38 }
 0x33d   :  { %v748_v62 = vsel %vm738_vm6, %v737_v55, -inf  ;;  %v765_v41 = vpop.xlane.xlu0 %764 }
 0x33e   :  { %749 = vmax.xlane.f32.xlu1 %v748_v62  ;;  %2418 = vrcp.f32 %v765_v41  ;;  %v786_v5 = vand.u32 2147483648, %v765_v41  ;;  %v784_v8 = vand.u32 2147483647, %v765_v41  ;;  %vm780_vm8 = vweird.f32 %v765_v41 }
 0x33f   :  { %2420 = vpow2.f32 %v757_v31 }
 0x340   :  { %v787_v9 = vor.u32 1.1754944e-38, %v786_v5  ;;  %vm785_vm10 = vcmp.eq.f32.partialorder %v784_v8, 8.507059e+37 }
 0x342   :  { %v3201_v59 = vpop.eup %2416 }
 0x343   :  { %v769_v0 = vsel %vm738_vm6, %v3201_v59, 0.0 }
 0x344   :  { %v2419_v1 = vpop.eup %2418  ;;  %770 = vadd.xlane.f32.xlu2 %v769_v0 }
 0x345   :  { %v776_v3 = vmul.f32 %v2419_v1, %v765_v41  ;;  %vm781_vm7 = vweird.f32 %v2419_v1 }
 0x346   :  { %vm782_vm9 = vmor %vm780_vm8, %vm781_vm7 }
 0x347   :  { %v777_v4 = vsub.f32 1.0, %v776_v3 }
 0x349   :  { %v778_v6 = vmul.f32 %v2419_v1, %v777_v4  ;;  %v3241_v4 = vpack.i.bf16 %v3066_v45, %v3081_v61 }
 0x34b   :  { %v779_v13 = vadd.f32 %v2419_v1, %v778_v6 }
 0x34d   :  { %v783_v11 = vsel %vm782_vm9, %v2419_v1, %v779_v13 }
 0x34e   :  { %v788_v25 = vsel %vm785_vm10, %v787_v9, %v783_v11 }
 0x34f   :  { %v831_v63 = vmul.f32 %v2415_v50, %v788_v25  ;;  %v968_v34 = vpop.permute.xlu1 %967 }
 0x350   :  { %v966_v5 = vpop.permute.xlu0 %965 }
 0x351   :  { %2204 = vmatmul.msk.f32.vlgmr.msra.gmra.mxu3 %vm738_vm6, %v831_v63 }
 0x352   :  { %2208 = vmatpush.xpose.msk.msra.mxu3 %vm605_vm1, %v3152_v17  ;;  %v3217_v17 = vpop.eup %2420 }
 0x353   :  { %v766_v33 = vsel %vm738_vm6, %v3217_v17, 0.0 }
 0x356   :  { %2209 = vmatpush.xpose.msk.msra.mxu3 %vm605_vm1, %v932_v16 }
 0x357   :  { %963 = vrot.lane.b32.xlu1 %v3095_v10, %s2690_s4 }
 0x35a   :  { %2210 = vmatpush.xpose.msk.msra.mxu3 %vm605_vm1, %v930_v14 }
 0x35c   :  { %1005 = vrot.lane.b32.xlu2 %v3107_v12, %s2690_s4 }
 0x35f   :  { %1001 = vrot.lane.b32.xlu1 %v3100_v2, %s2690_s4 }
 0x385   :  { %767 = vadd.xlane.f32.xlu2 %v766_v33 }
 0x39d   :  { %2299 = vrot.lane.b32.xlu2 %v3161_v48, %s2690_s4 }
 0x3a5   :  { %1317 = vrot.lane.b32.xlu2 %v3057_v46, %s2691_s6 }
 0x3ad   :  { %1315 = vrot.lane.b32.xlu2 %v3047_v36, %s2691_s6 }
 0x3b1   :  { %v750_v15 = vpop.xlane.xlu1 %749 }
 0x3b2   :  { %v754_v29 = vsub.f32 %v737_v55, %v750_v15 }
 0x3b4   :  { %v761_v39 = vmul.f32 1.442695, %v754_v29 }
 0x3b5   :  { %1313 = vrot.lane.b32.xlu2 %v3042_v27, %s2691_s6 }
 0x3b6   :  { %2422 = vpow2.f32 %v761_v39 }
 0x3b7   :  { %v771_v47 = vpop.xlane.xlu2 %770 }
 0x3b8   :  { %2424 = vrcp.f32 %v771_v47  ;;  %v814_v57 = vand.u32 2147483648, %v771_v47  ;;  %v812_v55 = vand.u32 2147483647, %v771_v47  ;;  %vm808_vm12 = vweird.f32 %v771_v47 }
 0x3ba   :  { %v815_v41 = vor.u32 1.1754944e-38, %v814_v57  ;;  %vm813_vm14 = vcmp.eq.f32.partialorder %v812_v55, 8.507059e+37 }
 0x3bc   :  { %v3229_v50 = vpop.eup %2422 }
 0x3bd   :  { %v772_v19 = vsel %vm738_vm6, %v3229_v50, 0.0  ;;  %1311 = vrot.lane.b32.xlu2 %v3064_v54, %s2691_s6 }
 0x3be   :  { %773 = vadd.xlane.f32.xlu1 %v772_v19  ;;  %v2425_v16 = vpop.eup %2424 }
 0x3bf   :  { %v804_v53 = vmul.f32 %v2425_v16, %v771_v47  ;;  %vm809_vm11 = vweird.f32 %v2425_v16  ;;  %v1006_v8 = vpop.permute.xlu2 %1005 }
 0x3c0   :  { %vm810_vm13 = vmor %vm808_vm12, %vm809_vm11 }
 0x3c1   :  { %v805_v20 = vsub.f32 1.0, %v804_v53 }
 0x3c3   :  { %v806_v38 = vmul.f32 %v2425_v16, %v805_v20 }
 0x3c5   :  { %v807_v62 = vadd.f32 %v2425_v16, %v806_v38  ;;  %1389 = vrot.lane.b32.xlu2 %v3107_v12, %s2691_s6 }
 0x3c7   :  { %v811_v0 = vsel %vm810_vm13, %v2425_v16, %v807_v62 }
 0x3c8   :  { %v816_v1 = vsel %vm813_vm14, %v815_v41, %v811_v0 }
 0x3c9   :  { %v833_v3 = vmul.f32 %v3201_v59, %v816_v1  ;;  %v964_v6 = vpop.permute.xlu1 %963  ;;  %v3252_v59 = vpack.i.bf16 %v3144_v49, %v3148_v42 }
 0x3cb   :  { %2206 = vmatmul.msk.f32.vlgmr.msrb.gmra.mxu3 %vm738_vm6, %v833_v3 }
 0x3cc   :  { %2212 = vmatpush.xpose.msk.msrb.mxu3 %vm605_vm1, %v3198_v52  ;;  %v1004_v52 = vpop.permute.xlu0 %1003 }
 0x3cd   :  { %2314 = vrot.lane.b32.xlu2 %v3241_v4, %s2690_s4 }
 0x3d0   :  { %2213 = vmatpush.xpose.msk.msrb.mxu3 %vm605_vm1, %v968_v34 }
 0x3d1   :  { %v1002_v13 = vpop.permute.xlu1 %1001 }
 0x3d3   :  { %2211 = vmatmul.msk.f32.vlgmr.msra.gmra.mxu3 %vm605_vm1, %v928_v24 }
 0x3d4   :  { %2214 = vmatpush.xpose.msk.msrb.mxu3 %vm605_vm1, %v966_v5  ;;  %v1000_v9 = vpop.permute.xlu0 %999 }
 0x3d7   :  { %2304 = vrot.lane.b32.xlu1 %v3252_v59, %s2690_s4 }
 0x3d8   :  { %2216 = vmatpush.xpose.msk.msra.mxu3 %vm605_vm1, %v1006_v8 }
 0x3db   :  { %2215 = vmatmul.msk.f32.vlgmr.msrb.gmra.mxu3 %vm605_vm1, %v964_v6 }
 0x3dc   :  { %2217 = vmatpush.xpose.msk.msra.mxu3 %vm605_vm1, %v1004_v52  ;;  %v1042_v63 = vpop.permute.xlu0 %1041 }
 0x3e0   :  { %2218 = vmatpush.xpose.msk.msra.mxu3 %vm605_vm1, %v1002_v13 }
 0x3e3   :  { %2219 = vmatmul.msk.f32.vlgmr.msra.gmra.mxu3 %vm605_vm1, %v1000_v9 }
 0x3e4   :  { %v1040_v53 = vpop.permute.xlu0 %1039 }
 0x3ec   :  { %v1038_v38 = vpop.permute.xlu0 %1037 }
 0x3f4   :  { %v1036_v13 = vpop.permute.xlu0 %1035 }
 0x3f8   :  { %v768_v11 = vpop.xlane.xlu2 %767 }
 0x3f9   :  { %2426 = vrcp.f32 %v768_v11  ;;  %v800_v31 = vand.u32 2147483648, %v768_v11  ;;  %v798_v15 = vand.u32 2147483647, %v768_v11  ;;  %vm794_vm0 = vweird.f32 %v768_v11 }
 0x3fb   :  { %v801_v39 = vor.u32 1.1754944e-38, %v800_v31  ;;  %vm799_vm3 = vcmp.eq.f32.partialorder %v798_v15, 8.507059e+37 }
 0x3ff   :  { %v2427_v25 = vpop.eup %2426 }
 0x400   :  { %v790_v14 = vmul.f32 %v2427_v25, %v768_v11  ;;  %v2300_v24 = vpop.permute.xlu2 %2299  ;;  %vm795_vm15 = vweird.f32 %v2427_v25 }
 0x401   :  { %v2301_v44 = vunpack.i.l.bf16 %v2300_v24  ;;  %v2302_v33 = vunpack.i.h.bf16 %v2300_v24  ;;  %vm796_vm2 = vmor %vm794_vm0, %vm795_vm15 }
 0x402   :  { %v791_v56 = vsub.f32 1.0, %v790_v14 }
 0x403   :  { %1199 = vmatpush.msrb.mxu3 %v2301_v44 }
 0x404   :  { %v792_v34 = vmul.f32 %v2427_v25, %v791_v56  ;;  %v3277_v56 = vpop.f32.mrf.mxu3 }
 0x405   :  { %1200 = vmatpush.msrb.mxu3 %v2302_v33  ;;  %v2310_v33 = vpop.permute.xlu0 %2309 }
 0x406   :  { %v793_v29 = vadd.f32 %v2427_v25, %v792_v34 }
 0x408   :  { %v797_v47 = vsel %vm796_vm2, %v2427_v25, %v793_v29  ;;  %v3261_v19 = vpop.permute.xlu2 %1317  ;;  %v2311_v29 = vunpack.i.l.bf16 %v2310_v33 }
 0x409   :  { %v802_v16 = vsel %vm799_vm3, %v801_v39, %v797_v47  ;;  %v2312_v39 = vunpack.i.h.bf16 %v2310_v33 }
 0x40a   :  { %v832_v20 = vmul.f32 %v3217_v17, %v802_v16 }
 0x40c   :  { %2205 = vmatmul.msk.f32.vlgmr.msra.gmra.mxu0 %vm738_vm6, %v832_v20 }
 0x40d   :  { %2220 = vmatpush.xpose.msk.msra.mxu0 %vm605_vm1, %v1042_v63 }
 0x410   :  { %v3266_v57 = vpop.permute.xlu2 %1315 }
 0x411   :  { %2221 = vmatpush.xpose.msk.msra.mxu0 %vm605_vm1, %v1040_v53 }
 0x415   :  { %2222 = vmatpush.xpose.msk.msra.mxu0 %vm605_vm1, %v1038_v38 }
 0x418   :  { %v3270_v55 = vpop.permute.xlu2 %1313 }
 0x420   :  { %v3272_v62 = vpop.permute.xlu2 %1311 }
 0x428   :  { %v1390_v41 = vpop.permute.xlu2 %1389 }
 0x429   :  { %2236 = vmatpush.xpose.msk.msrb.mxu1 %vm605_vm1, %v1390_v41 }
 0x430   :  { %v2315_v11 = vpop.permute.xlu2 %2314 }
 0x431   :  { %v774_v0 = vpop.xlane.xlu1 %773  ;;  %v2316_v24 = vunpack.i.l.bf16 %v2315_v11  ;;  %v2317_v44 = vunpack.i.h.bf16 %v2315_v11 }
 0x432   :  { %2428 = vrcp.f32 %v774_v0  ;;  %v828_v5 = vand.u32 2147483648, %v774_v0  ;;  %v826_v8 = vand.u32 2147483647, %v774_v0  ;;  %vm822_vm5 = vweird.f32 %v774_v0 }
 0x434   :  { %v829_v9 = vor.u32 1.1754944e-38, %v828_v5  ;;  %vm827_vm8 = vcmp.eq.f32.partialorder %v826_v8, 8.507059e+37 }
 0x438   :  { %v2429_v17 = vpop.eup %2428 }
 0x439   :  { %v818_v1 = vmul.f32 %v2429_v17, %v774_v0  ;;  %vm823_vm4 = vweird.f32 %v2429_v17 }
 0x43a   :  { %vm824_vm7 = vmor %vm822_vm5, %vm823_vm4 }
 0x43b   :  { %v819_v3 = vsub.f32 1.0, %v818_v1 }
 0x43d   :  { %v820_v6 = vmul.f32 %v2429_v17, %v819_v3  ;;  %v3287_v3 = vpack.i.bf16 %v3169_v23, %v3166_v51 }
 0x43f   :  { %v821_v52 = vadd.f32 %v2429_v17, %v820_v6 }
 0x441   :  { %v825_v25 = vsel %vm824_vm7, %v2429_v17, %v821_v52 }
 0x442   :  { %v830_v63 = vsel %vm827_vm8, %v829_v9, %v825_v25 }
 0x443   :  { %v834_v14 = vmul.f32 %v3229_v50, %v830_v63 }
 0x445   :  { %2207 = vmatmul.msk.f32.vlgmr.msrb.gmra.mxu0 %vm738_vm6, %v834_v14 }
 0x446   :  { %1234 = vmatpush.msrb.mxu0 %v2316_v24 }
 0x448   :  { %1235 = vmatpush.msrb.mxu0 %v2317_v44 }
 0x449   :  { %v2305_v31 = vpop.permute.xlu1 %2304 }
 0x44a   :  { %v2307_v34 = vunpack.i.h.bf16 %v2305_v31  ;;  %v2306_v15 = vunpack.i.l.bf16 %v2305_v31 }
 0x44c   :  { %1201 = vmatpush.msrb.mxu3 %v2306_v15 }
 0x44d   :  { %2223 = vmatmul.msk.f32.vlgmr.msra.gmra.mxu0 %vm605_vm1, %v1036_v13 }
 0x44e   :  { %1269 = vmatpush.msra.mxu3 %v2307_v34  ;;  %v3280_v47 = vpop.f32.mrf.mxu3  ;;  %v3310_v34 = vpack.i.bf16 %v3156_v26, %v3158_v40 }
 0x450   :  { %1270 = vmatpush.msra.mxu3 %v2311_v29 }
 0x452   :  { %1271 = vmatpush.msra.mxu3 %v2312_v39 }
 0x456   :  { %v960_v50 = vpop.f32.mrf.mxu3 }
 0x457   :  { %v1071_v16 = vmul.f32 0.17677669, %v960_v50 }
 0x459   :  { %v1075_v53 = vsel %vm738_vm6, %v1071_v16, -inf }
 0x45a   :  { %1076 = vmax.xlane.f32.xlu2 %v1075_v53 }
 0x45e   :  { %v996_v20 = vpop.f32.mrf.mxu3 }
 0x45f   :  { %v1072_v38 = vmul.f32 0.17677669, %v996_v20 }
 0x461   :  { %v1078_v41 = vsel %vm738_vm6, %v1072_v38, -inf }
 0x462   :  { %1079 = vmax.xlane.f32.xlu2 %v1078_v41 }
 0x466   :  { %v1032_v0 = vpop.f32.mrf.mxu3 }
 0x467   :  { %v1073_v17 = vmul.f32 0.17677669, %v1032_v0 }
 0x469   :  { %v1081_v1 = vsel %vm738_vm6, %v1073_v17, -inf }
 0x46a   :  { %1082 = vmax.xlane.f32.xlu0 %v1081_v1 }
 0x47a   :  { %2319 = vrot.lane.b32.xlu2 %v3287_v3, %s2690_s4 }
 0x47e   :  { %1383 = vrot.lane.b32.xlu0 %v3116_v35, %s2691_s6 }
 0x482   :  { %1385 = vrot.lane.b32.xlu2 %v3100_v2, %s2691_s6 }
 0x486   :  { %1423 = vrot.lane.b32.xlu0 %v3134_v18, %s2691_s6 }
 0x489   :  { %v3297_v5 = vpop.f32.mrf.mxu0 }
 0x4c2   :  { %v3299_v6 = vpop.f32.mrf.mxu0 }
 0x4ca   :  { %v1068_v8 = vpop.f32.mrf.mxu0 }
 0x4cb   :  { %v1074_v52 = vmul.f32 0.17677669, %v1068_v8 }
 0x4cd   :  { %v1084_v13 = vsel %vm738_vm6, %v1074_v52, -inf  ;;  %v1077_v9 = vpop.xlane.xlu2 %1076 }
 0x4ce   :  { %1085 = vmax.xlane.f32.xlu1 %v1084_v13  ;;  %v1087_v11 = vsub.f32 %v1071_v16, %v1077_v9 }
 0x4d0   :  { %v1091_v25 = vmul.f32 1.442695, %v1087_v11 }
 0x4d2   :  { %2430 = vpow2.f32 %v1091_v25 }
 0x4d5   :  { %v1080_v63 = vpop.xlane.xlu2 %1079 }
 0x4d6   :  { %v1088_v15 = vsub.f32 %v1072_v38, %v1080_v63 }
 0x4d8   :  { %v3302_v14 = vpop.eup %2430  ;;  %v1093_v29 = vmul.f32 1.442695, %v1088_v15 }
 0x4d9   :  { %v1099_v24 = vsel %vm738_vm6, %v3302_v14, 0.0 }
 0x4da   :  { %1100 = vadd.xlane.f32.xlu2 %v1099_v24  ;;  %2432 = vpow2.f32 %v1093_v29 }
 0x4dd   :  { %v2320_v44 = vpop.permute.xlu2 %2319  ;;  %v1083_v39 = vpop.xlane.xlu0 %1082 }
 0x4de   :  { %v2322_v31 = vunpack.i.h.bf16 %v2320_v44  ;;  %v2321_v33 = vunpack.i.l.bf16 %v2320_v44  ;;  %v1089_v50 = vsub.f32 %v1073_v17, %v1083_v39 }
 0x4e0   :  { %1236 = vmatpush.msrb.mxu0 %v2321_v33  ;;  %v1095_v16 = vmul.f32 1.442695, %v1089_v50  ;;  %v3320_v53 = vpop.eup %2432 }
 0x4e1   :  { %v1102_v20 = vsel %vm738_vm6, %v3320_v53, 0.0 }
 0x4e2   :  { %1304 = vmatpush.msra.mxu0 %v2322_v31  ;;  %2434 = vpow2.f32 %v1095_v16 }
 0x4e5   :  { %v1386_v8 = vpop.permute.xlu2 %1385 }
 0x4e7   :  { %1387 = vrot.lane.b32.xlu1 %v3103_v28, %s2691_s6 }
 0x4e8   :  { %v3324_v41 = vpop.eup %2434 }
 0x4e9   :  { %v1105_v38 = vsel %vm738_vm6, %v3324_v41, 0.0 }
 0x4f0   :  { %v1384_v31 = vpop.permute.xlu0 %1383 }
 0x4f2   :  { %2324 = vrot.lane.b32.xlu2 %v3310_v34, %s2690_s4 }
 0x4fa   :  { %1425 = vrot.lane.b32.xlu2 %v3140_v30, %s2691_s6 }
 0x502   :  { %1349 = vrot.lane.b32.xlu2 %v3074_v58, %s2691_s6 }
 0x50a   :  { %1419 = vrot.lane.b32.xlu2 %v3138_v22, %s2691_s6 }
 0x511   :  { %1103 = vadd.xlane.f32.xlu1 %v1102_v20 }
 0x519   :  { %1106 = vadd.xlane.f32.xlu1 %v1105_v38 }
 0x532   :  { %1353 = vrot.lane.b32.xlu1 %v3087_v7, %s2691_s6 }
 0x53a   :  { %1351 = vrot.lane.b32.xlu1 %v3084_v43, %s2691_s6 }
 0x541   :  { %v1086_v0 = vpop.xlane.xlu1 %1085 }
 0x542   :  { %v1090_v17 = vsub.f32 %v1074_v52, %v1086_v0  ;;  %1421 = vrot.lane.b32.xlu1 %v3130_v32, %s2691_s6 }
 0x544   :  { %v1097_v1 = vmul.f32 1.442695, %v1090_v17 }
 0x546   :  { %2436 = vpow2.f32 %v1097_v1 }
 0x54c   :  { %v3334_v13 = vpop.eup %2436 }
 0x54d   :  { %v1108_v9 = vsel %vm738_vm6, %v3334_v13, 0.0  ;;  %v1101_v11 = vpop.xlane.xlu2 %1100 }
 0x54e   :  { %1109 = vadd.xlane.f32.xlu0 %v1108_v9  ;;  %2438 = vrcp.f32 %v1101_v11  ;;  %v1122_v33 = vand.u32 2147483648, %v1101_v11  ;;  %v1120_v50 = vand.u32 2147483647, %v1101_v11  ;;  %vm1116_vm10 = vweird.f32 %v1101_v11  ;;  %v1424_v9 = vpop.permute.xlu0 %1423 }
 0x550   :  { %v1123_v20 = vor.u32 1.1754944e-38, %v1122_v33  ;;  %vm1121_vm12 = vcmp.eq.f32.partialorder %v1120_v50, 8.507059e+37 }
 0x554   :  { %v2439_v25 = vpop.eup %2438 }
 0x555   :  { %v1112_v63 = vmul.f32 %v2439_v25, %v1101_v11  ;;  %v2325_v24 = vpop.permute.xlu2 %2324  ;;  %vm1117_vm9 = vweird.f32 %v2439_v25 }
 0x556   :  { %v2326_v44 = vunpack.i.l.bf16 %v2325_v24  ;;  %v2327_v15 = vunpack.i.h.bf16 %v2325_v24  ;;  %vm1118_vm11 = vmor %vm1116_vm10, %vm1117_vm9 }
 0x557   :  { %v1113_v52 = vsub.f32 1.0, %v1112_v63 }
 0x558   :  { %1305 = vmatpush.msra.mxu0 %v2326_v44 }
 0x559   :  { %v1388_v29 = vpop.permute.xlu1 %1387  ;;  %v1114_v39 = vmul.f32 %v2439_v25, %v1113_v52 }
 0x55a   :  { %2237 = vmatpush.xpose.msk.msrb.mxu1 %vm605_vm1, %v1388_v29  ;;  %1306 = vmatpush.msra.mxu0 %v2327_v15 }
 0x55b   :  { %v1115_v16 = vadd.f32 %v2439_v25, %v1114_v39 }
 0x55d   :  { %v1119_v38 = vsel %vm1118_vm11, %v2439_v25, %v1115_v16  ;;  %v1426_v0 = vpop.permute.xlu2 %1425 }
 0x55e   :  { %2238 = vmatpush.xpose.msk.msrb.mxu1 %vm605_vm1, %v1386_v8  ;;  %v1124_v17 = vsel %vm1121_vm12, %v1123_v20, %v1119_v38  ;;  %2240 = vmatpush.xpose.msk.msrb.mxu2 %vm605_vm1, %v1426_v0 }
 0x55f   :  { %v1167_v1 = vmul.f32 %v3302_v14, %v1124_v17 }
 0x561   :  { %2239 = vmatmul.msk.f32.vlgmr.msrb.gmra.mxu1 %vm605_vm1, %v1384_v31  ;;  %2224 = vmatmul.msk.f32.vlgmr.msrb.gmra.mxu3 %vm738_vm6, %v1167_v1 }
 0x562   :  { %1347 = vrot.lane.b32.xlu0 %v3095_v10, %s2691_s6  ;;  %2228 = vmatpush.xpose.msk.msrb.mxu3 %vm605_vm1, %v3261_v19 }
 0x563   :  { %2241 = vmatpush.xpose.msk.msrb.mxu2 %vm605_vm1, %v1424_v9 }
 0x566   :  { %2229 = vmatpush.xpose.msk.msrb.mxu3 %vm605_vm1, %v3266_v57 }
 0x56a   :  { %2230 = vmatpush.xpose.msk.msrb.mxu3 %vm605_vm1, %v3270_v55 }
 0x584   :  { %v1104_v14 = vpop.xlane.xlu1 %1103 }
 0x585   :  { %2440 = vrcp.f32 %v1104_v14  ;;  %v1136_v24 = vand.u32 2147483648, %v1104_v14  ;;  %v1134_v31 = vand.u32 2147483647, %v1104_v14  ;;  %vm1130_vm14 = vweird.f32 %v1104_v14 }
 0x587   :  { %v1137_v33 = vor.u32 1.1754944e-38, %v1136_v24  ;;  %vm1135_vm0 = vcmp.eq.f32.partialorder %v1134_v31, 8.507059e+37 }
 0x58b   :  { %v2441_v8 = vpop.eup %2440 }
 0x58c   :  { %v1126_v11 = vmul.f32 %v2441_v8, %v1104_v14  ;;  %v1107_v25 = vpop.xlane.xlu1 %1106  ;;  %vm1131_vm13 = vweird.f32 %v2441_v8 }
 0x58d   :  { %2442 = vrcp.f32 %v1107_v25  ;;  %vm1132_vm15 = vmor %vm1130_vm14, %vm1131_vm13  ;;  %v1150_v50 = vand.u32 2147483648, %v1107_v25  ;;  %v1148_v20 = vand.u32 2147483647, %v1107_v25  ;;  %vm1144_vm3 = vweird.f32 %v1107_v25 }
 0x58e   :  { %v1127_v63 = vsub.f32 1.0, %v1126_v11 }
 0x58f   :  { %v1151_v0 = vor.u32 1.1754944e-38, %v1150_v50  ;;  %vm1149_vm5 = vcmp.eq.f32.partialorder %v1148_v20, 8.507059e+37 }
 0x590   :  { %v1128_v44 = vmul.f32 %v2441_v8, %v1127_v63 }
 0x592   :  { %v1129_v19 = vadd.f32 %v2441_v8, %v1128_v44 }
 0x593   :  { %v2443_v52 = vpop.eup %2442 }
 0x594   :  { %v1133_v57 = vsel %vm1132_vm15, %v2441_v8, %v1129_v19  ;;  %v1140_v15 = vmul.f32 %v2443_v52, %v1107_v25  ;;  %vm1145_vm2 = vweird.f32 %v2443_v52  ;;  %v1350_v8 = vpop.permute.xlu2 %1349 }
 0x595   :  { %v1138_v55 = vsel %vm1135_vm0, %v1137_v33, %v1133_v57  ;;  %vm1146_vm4 = vmor %vm1144_vm3, %vm1145_vm2 }
 0x596   :  { %v1141_v29 = vsub.f32 1.0, %v1140_v15  ;;  %v1168_v39 = vmul.f32 %v3320_v53, %v1138_v55 }
 0x598   :  { %v1142_v16 = vmul.f32 %v2443_v52, %v1141_v29  ;;  %2225 = vmatmul.msk.f32.vlgmr.msrb.gmra.mxu0 %vm738_vm6, %v1168_v39 }
 0x59a   :  { %v1143_v38 = vadd.f32 %v2443_v52, %v1142_v16 }
 0x59c   :  { %v1147_v17 = vsel %vm1146_vm4, %v2443_v52, %v1143_v38  ;;  %v1420_v25 = vpop.permute.xlu2 %1419 }
 0x59d   :  { %v1152_v1 = vsel %vm1149_vm5, %v1151_v0, %v1147_v17 }
 0x59e   :  { %v1169_v9 = vmul.f32 %v3324_v41, %v1152_v1 }
 0x5a0   :  { %2226 = vmatmul.msk.f32.vlgmr.msra.gmra.mxu3 %vm738_vm6, %v1169_v9 }
 0x5a4   :  { %v1354_v14 = vpop.permute.xlu1 %1353 }
 0x5a5   :  { %2232 = vmatpush.xpose.msk.msrb.mxu0 %vm605_vm1, %v1354_v14 }
 0x5a8   :  { %2231 = vmatmul.msk.f32.vlgmr.msrb.gmra.mxu3 %vm605_vm1, %v3272_v62 }
 0x5ac   :  { %v1352_v53 = vpop.permute.xlu1 %1351 }
 0x5ad   :  { %2233 = vmatpush.xpose.msk.msrb.mxu0 %vm605_vm1, %v1352_v53 }
 0x5b1   :  { %2234 = vmatpush.xpose.msk.msrb.mxu0 %vm605_vm1, %v1350_v8 }
 0x5b4   :  { %v1422_v11 = vpop.permute.xlu1 %1421 }
 0x5b5   :  { %2242 = vmatpush.xpose.msk.msrb.mxu2 %vm605_vm1, %v1422_v11 }
 0x5b8   :  { %2243 = vmatmul.msk.f32.vlgmr.msrb.gmra.mxu2 %vm605_vm1, %v1420_v25 }
 0x5c1   :  { %v1110_v41 = vpop.xlane.xlu0 %1109 }
 0x5c2   :  { %2444 = vrcp.f32 %v1110_v41  ;;  %v1164_v31 = vand.u32 2147483648, %v1110_v41  ;;  %v1162_v62 = vand.u32 2147483647, %v1110_v41  ;;  %vm1158_vm8 = vweird.f32 %v1110_v41 }
 0x5c4   :  { %v1165_v33 = vor.u32 1.1754944e-38, %v1164_v31  ;;  %vm1163_vm10 = vcmp.eq.f32.partialorder %v1162_v62, 8.507059e+37 }
 0x5c8   :  { %v2445_v63 = vpop.eup %2444 }
 0x5c9   :  { %v1154_v24 = vmul.f32 %v2445_v63, %v1110_v41  ;;  %vm1159_vm7 = vweird.f32 %v2445_v63 }
 0x5ca   :  { %vm1160_vm9 = vmor %vm1158_vm8, %vm1159_vm7 }
 0x5cb   :  { %v1155_v44 = vsub.f32 1.0, %v1154_v24 }
 0x5cd   :  { %v1156_v19 = vmul.f32 %v2445_v63, %v1155_v44 }
 0x5cf   :  { %v1157_v52 = vadd.f32 %v2445_v63, %v1156_v19 }
 0x5d1   :  { %v1161_v57 = vsel %vm1160_vm9, %v2445_v63, %v1157_v52 }
 0x5d2   :  { %v1166_v15 = vsel %vm1163_vm10, %v1165_v33, %v1161_v57 }
 0x5d3   :  { %v1170_v55 = vmul.f32 %v3334_v13, %v1166_v15 }
 0x5d4   :  { %v1348_v29 = vpop.permute.xlu0 %1347 }
 0x5d5   :  { %2227 = vmatmul.msk.f32.vlgmr.msra.gmra.mxu0 %vm738_vm6, %v1170_v55 }
 0x5dd   :  { %2235 = vmatmul.msk.f32.vlgmr.msrb.gmra.mxu0 %vm605_vm1, %v1348_v29 }
 0x5de   :  { %v1416_v39 = vpop.f32.mrf.mxu1 }
 0x5df   :  { %v1457_v50 = vmul.f32 0.17677669, %v1416_v39 }
 0x5e1   :  { %v1465_v16 = vsel %vm738_vm6, %v1457_v50, -inf }
 0x5e2   :  { %1466 = vmax.xlane.f32.xlu0 %v1465_v16 }
 0x5e4   :  { %v3376_v13 = vpop.f32.mrf.mxu3 }
 0x5f6   :  { %1687 = vrot.lane.b32.xlu0 %v3047_v36, %s2692_s12 }
 0x5fe   :  { %1685 = vrot.lane.b32.xlu0 %v3042_v27, %s2692_s12 }
 0x606   :  { %1683 = vrot.lane.b32.xlu0 %v3064_v54, %s2692_s12 }
 0x60e   :  { %1761 = vrot.lane.b32.xlu0 %v3107_v12, %s2692_s12 }
 0x615   :  { %v3378_v20 = vpop.f32.mrf.mxu0 }
 0x616   :  { %v2383_v38 = vpack.i.bf16 %v3378_v20, %v3376_v13  ;;  %1725 = vrot.lane.b32.xlu0 %v3087_v7, %s2692_s12 }
 0x61e   :  { %1759 = vrot.lane.b32.xlu0 %v3103_v28, %s2692_s12 }
 0x623   :  { %v3403_v0 = vpop.f32.mrf.mxu3 }
 0x626   :  { %1723 = vrot.lane.b32.xlu0 %v3084_v43, %s2692_s12 }
 0x62e   :  { %2344 = vrot.lane.b32.xlu0 %v3241_v4, %s2691_s6 }
 0x636   :  { %1755 = vrot.lane.b32.xlu0 %v3116_v35, %s2692_s12 }
 0x63b   :  { %v1452_v27 = vpop.f32.mrf.mxu2 }
 0x63c   :  { %v1458_v36 = vmul.f32 0.17677669, %v1452_v27 }
 0x63e   :  { %2349 = vrot.lane.b32.xlu0 %v3287_v3, %s2691_s6  ;;  %v1468_v54 = vsel %vm738_vm6, %v1458_v36, -inf }
 0x63f   :  { %1469 = vmax.xlane.f32.xlu1 %v1468_v54 }
 0x652   :  { %v3413_v8 = vpop.f32.mrf.mxu0 }
 0x655   :  { %v1467_v7 = vpop.xlane.xlu0 %1466 }
 0x656   :  { %v1473_v12 = vsub.f32 %v1457_v50, %v1467_v7 }
 0x658   :  { %v1479_v28 = vmul.f32 1.442695, %v1473_v12  ;;  %1689 = vrot.lane.b32.xlu1 %v3057_v46, %s2692_s12  ;;  %v1344_v46 = vpop.f32.mrf.mxu3 }
 0x659   :  { %v1455_v9 = vmul.f32 0.17677669, %v1344_v46 }
 0x65a   :  { %2446 = vpow2.f32 %v1479_v28  ;;  %v1380_v25 = vpop.f32.mrf.mxu0 }
 0x65b   :  { %v1456_v41 = vmul.f32 0.17677669, %v1380_v25 }
 0x65d   :  { %v1462_v44 = vsel %vm738_vm6, %v1456_v41, -inf }
 0x660   :  { %v3397_v43 = vpop.eup %2446  ;;  %2334 = vrot.lane.b32.xlu1 %v3252_v59, %s2691_s6  ;;  %v1459_v59 = vsel %vm738_vm6, %v1455_v9, -inf }
 0x661   :  { %v1489_v35 = vsel %vm738_vm6, %v3397_v43, 0.0 }
 0x662   :  { %1490 = vadd.xlane.f32.xlu2 %v1489_v35 }
 0x668   :  { %v1688_v4 = vpop.permute.xlu0 %1687 }
 0x670   :  { %v1686_v3 = vpop.permute.xlu0 %1685 }
 0x678   :  { %v1684_v17 = vpop.permute.xlu0 %1683 }
 0x67a   :  { %2329 = vrot.lane.b32.xlu2 %v3161_v48, %s2691_s6 }
 0x680   :  { %v3407_v1 = vpop.permute.xlu0 %1761 }
 0x688   :  { %v1726_v14 = vpop.permute.xlu0 %1725 }
 0x689   :  { %2252 = vmatpush.xpose.msk.msra.mxu0 %vm605_vm1, %v1726_v14 }
 0x68a   :  { %1460 = vmax.xlane.f32.xlu1 %v1459_v59 }
 0x690   :  { %v3411_v53 = vpop.permute.xlu0 %1759 }
 0x698   :  { %v1724_v11 = vpop.permute.xlu0 %1723 }
 0x699   :  { %2253 = vmatpush.xpose.msk.msra.mxu0 %vm605_vm1, %v1724_v11 }
 0x6a0   :  { %v2345_v63 = vpop.permute.xlu0 %2344 }
 0x6a1   :  { %v2346_v24 = vunpack.i.l.bf16 %v2345_v63  ;;  %v2347_v31 = vunpack.i.h.bf16 %v2345_v63 }
 0x6a3   :  { %1612 = vmatpush.msra.mxu1 %v2346_v24  ;;  %1463 = vmax.xlane.f32.xlu2 %v1462_v44 }
 0x6a4   :  { %2339 = vrot.lane.b32.xlu1 %v3194_v37, %s2691_s6 }
 0x6a5   :  { %1613 = vmatpush.msra.mxu1 %v2347_v31 }
 0x6a8   :  { %v3419_v19 = vpop.permute.xlu0 %1755 }
 0x6b0   :  { %v2350_v62 = vpop.permute.xlu0 %2349 }
 0x6b1   :  { %v2352_v52 = vunpack.i.h.bf16 %v2350_v62  ;;  %v2351_v33 = vunpack.i.l.bf16 %v2350_v62 }
 0x6b2   :  { %v1470_v57 = vpop.xlane.xlu1 %1469 }
 0x6b3   :  { %1614 = vmatpush.msra.mxu1 %v2351_v33  ;;  %v1474_v15 = vsub.f32 %v1458_v36, %v1470_v57 }
 0x6b5   :  { %1676 = vmatpush.msrb.mxu1 %v2352_v52  ;;  %v1481_v55 = vmul.f32 1.442695, %v1474_v15 }
 0x6b7   :  { %2448 = vpow2.f32 %v1481_v55 }
 0x6bb   :  { %1757 = vrot.lane.b32.xlu2 %v3100_v2, %s2692_s12 }
 0x6bd   :  { %v3425_v29 = vpop.eup %2448 }
 0x6be   :  { %v1492_v39 = vsel %vm738_vm6, %v3425_v29, 0.0 }
 0x6c3   :  { %1719 = vrot.lane.b32.xlu2 %v3095_v10, %s2692_s12 }
 0x6ca   :  { %v1690_v37 = vpop.permute.xlu1 %1689 }
 0x6cb   :  { %2248 = vmatpush.xpose.msk.msra.mxu2 %vm605_vm1, %v1690_v37 }
 0x6ce   :  { %1493 = vadd.xlane.f32.xlu1 %v1492_v39 }
 0x6cf   :  { %2249 = vmatpush.xpose.msk.msra.mxu2 %vm605_vm1, %v1688_v4 }
 0x6d2   :  { %v2335_v16 = vpop.permute.xlu1 %2334 }
 0x6d3   :  { %2250 = vmatpush.xpose.msk.msra.mxu2 %vm605_vm1, %v1686_v3  ;;  %v2336_v36 = vunpack.i.l.bf16 %v2335_v16  ;;  %v2337_v54 = vunpack.i.h.bf16 %v2335_v16 }
 0x6d5   :  { %v3432_v2 = vpop.xlane.xlu2 %1490 }
 0x6d6   :  { %2251 = vmatmul.msk.f32.vlgmr.msra.gmra.mxu2 %vm605_vm1, %v1684_v17  ;;  %vm1528_vm0 = vweird.f32 %v3432_v2 }
 0x6dd   :  { %v2330_v50 = vpop.permute.xlu2 %2329 }
 0x6de   :  { %v2331_v10 = vunpack.i.l.bf16 %v2330_v50  ;;  %v2332_v27 = vunpack.i.h.bf16 %v2330_v50 }
 0x6e0   :  { %1580 = vmatpush.msra.mxu3 %v2331_v10 }
 0x6e2   :  { %1581 = vmatpush.msra.mxu3 %v2332_v27  ;;  %v1534_v27 = vand.u32 2147483648, %v3432_v2 }
 0x6e4   :  { %1582 = vmatpush.msra.mxu3 %v2336_v36 }
 0x6e6   :  { %1644 = vmatpush.msrb.mxu3 %v2337_v54  ;;  %v1532_v54 = vand.u32 2147483647, %v3432_v2 }
 0x6e7   :  { %1721 = vrot.lane.b32.xlu1 %v3074_v58, %s2692_s12 }
 0x6e8   :  { %vm1533_vm3 = vcmp.eq.f32.partialorder %v1532_v54, 8.507059e+37 }
 0x6ef   :  { %1791 = vrot.lane.b32.xlu1 %v3138_v22, %s2692_s12 }
 0x6fd   :  { %v1461_v7 = vpop.xlane.xlu1 %1460 }
 0x6fe   :  { %v1471_v12 = vsub.f32 %v1455_v9, %v1461_v7 }
 0x700   :  { %v1475_v28 = vmul.f32 1.442695, %v1471_v12 }
 0x702   :  { %2450 = vpow2.f32 %v1475_v28 }
 0x708   :  { %v2451_v35 = vpop.eup %2450 }
 0x709   :  { %v1483_v4 = vsel %vm738_vm6, %v2451_v35, 0.0 }
 0x70a   :  { %1484 = vadd.xlane.f32.xlu0 %v1483_v4 }
 0x716   :  { %v2340_v3 = vpop.permute.xlu1 %2339  ;;  %v1464_v17 = vpop.xlane.xlu2 %1463 }
 0x717   :  { %v2341_v46 = vunpack.i.l.bf16 %v2340_v3  ;;  %v1472_v14 = vsub.f32 %v1456_v41, %v1464_v17  ;;  %v2342_v59 = vunpack.i.h.bf16 %v2340_v3  ;;  %v1535_v3 = vor.u32 1.1754944e-38, %v1534_v27 }
 0x719   :  { %v1477_v11 = vmul.f32 1.442695, %v1472_v14  ;;  %1645 = vmatpush.msrb.mxu3 %v2341_v46 }
 0x71b   :  { %2452 = vpow2.f32 %v1477_v11  ;;  %1646 = vmatpush.msrb.mxu3 %v2342_v59 }
 0x71c   :  { %2454 = vrcp.f32 %v3432_v2 }
 0x71e   :  { %2354 = vrot.lane.b32.xlu0 %v3310_v34, %s2691_s6  ;;  %v1758_v25 = vpop.permute.xlu2 %1757 }
 0x721   :  { %v3442_v58 = vpop.eup %2452 }
 0x722   :  { %v1486_v22 = vsel %vm738_vm6, %v3442_v58, 0.0 }
 0x723   :  { %1487 = vadd.xlane.f32.xlu2 %v1486_v22 }
 0x726   :  { %1795 = vrot.lane.b32.xlu0 %v3134_v18, %s2692_s12  ;;  %v1720_v24 = vpop.permute.xlu2 %1719 }
 0x73b   :  { %1797 = vrot.lane.b32.xlu2 %v3140_v30, %s2692_s12 }
 0x741   :  { %v3452_v9 = vpop.xlane.xlu1 %1493 }
 0x742   :  { %vm1542_vm10 = vweird.f32 %v3452_v9 }
 0x743   :  { %1793 = vrot.lane.b32.xlu2 %v3130_v32, %s2692_s12  ;;  %v2455_v32 = vpop.eup %2454 }
 0x744   :  { %v1524_v30 = vmul.f32 %v2455_v32, %v3432_v2  ;;  %vm1529_vm14 = vweird.f32 %v2455_v32 }
 0x745   :  { %vm1530_vm2 = vmor %vm1528_vm0, %vm1529_vm14 }
 0x746   :  { %v1525_v62 = vsub.f32 1.0, %v1524_v30 }
 0x748   :  { %v1526_v15 = vmul.f32 %v2455_v32, %v1525_v62  ;;  %v1546_v62 = vand.u32 2147483647, %v3452_v9 }
 0x74a   :  { %v1527_v10 = vadd.f32 %v2455_v32, %v1526_v15 }
 0x74c   :  { %v1531_v28 = vsel %vm1530_vm2, %v2455_v32, %v1527_v10 }
 0x74d   :  { %v1536_v46 = vsel %vm1533_vm3, %v1535_v3, %v1531_v28 }
 0x74e   :  { %v1553_v14 = vmul.f32 %v3397_v43, %v1536_v46 }
 0x759   :  { %v1722_v41 = vpop.permute.xlu1 %1721  ;;  %v1716_v34 = vpop.f32.mrf.mxu2 }
 0x75a   :  { %v3454_v63 = vmul.f32 0.17677669, %v1716_v34  ;;  %2254 = vmatpush.xpose.msk.msra.mxu0 %vm605_vm1, %v1722_v41 }
 0x75c   :  { %v1831_v44 = vsel %vm738_vm6, %v3454_v63, -inf }
 0x75d   :  { %2255 = vmatmul.msk.f32.vlgmr.msra.gmra.mxu0 %vm605_vm1, %v1720_v24  ;;  %1832 = vmax.xlane.f32.xlu0 %v1831_v44 }
 0x77d   :  { %v1485_v18 = vpop.xlane.xlu0 %1484 }
 0x77e   :  { %2456 = vrcp.f32 %v1485_v18  ;;  %v1506_v57 = vand.u32 2147483648, %v1485_v18  ;;  %v1504_v37 = vand.u32 2147483647, %v1485_v18  ;;  %vm1500_vm12 = vweird.f32 %v1485_v18 }
 0x77f   :  { %2458 = vrcp.f32 %v3452_v9 }
 0x780   :  { %v1507_v50 = vor.u32 1.1754944e-38, %v1506_v57  ;;  %vm1505_vm15 = vcmp.eq.f32.partialorder %v1504_v37, 8.507059e+37 }
 0x784   :  { %v2457_v31 = vpop.eup %2456 }
 0x785   :  { %v1496_v52 = vmul.f32 %v2457_v31, %v1485_v18  ;;  %vm1501_vm11 = vweird.f32 %v2457_v31 }
 0x786   :  { %vm1502_vm13 = vmor %vm1500_vm12, %vm1501_vm11  ;;  %vm1547_vm12 = vcmp.eq.f32.partialorder %v1546_v62, 8.507059e+37 }
 0x787   :  { %v1497_v33 = vsub.f32 1.0, %v1496_v52 }
 0x789   :  { %v1498_v55 = vmul.f32 %v2457_v31, %v1497_v33 }
 0x78b   :  { %v1499_v39 = vadd.f32 %v2457_v31, %v1498_v55 }
 0x78d   :  { %v1503_v16 = vsel %vm1502_vm13, %v2457_v31, %v1499_v39 }
 0x78e   :  { %v1508_v36 = vsel %vm1505_vm15, %v1507_v50, %v1503_v16 }
 0x78f   :  { %v1551_v7 = vmul.f32 %v2451_v35, %v1508_v36  ;;  %v2459_v35 = vpop.eup %2458 }
 0x790   :  { %v2355_v12 = vpop.permute.xlu0 %2354  ;;  %v1538_v59 = vmul.f32 %v2459_v35, %v3452_v9  ;;  %vm1543_vm8 = vweird.f32 %v2459_v35 }
 0x791   :  { %v2356_v4 = vunpack.i.l.bf16 %v2355_v12  ;;  %2244 = vmatmul.msk.f32.vlgmr.msra.gmra.mxu3 %vm738_vm6, %v1551_v7  ;;  %v2357_v17 = vunpack.i.h.bf16 %v2355_v12  ;;  %vm1544_vm11 = vmor %vm1542_vm10, %vm1543_vm8 }
 0x792   :  { %2256 = vmatpush.xpose.msk.msra.mxu3 %vm605_vm1, %v3407_v1  ;;  %v1539_v11 = vsub.f32 1.0, %v1538_v59 }
 0x793   :  { %1677 = vmatpush.msrb.mxu1 %v2356_v4 }
 0x795   :  { %1678 = vmatpush.msrb.mxu1 %v2357_v17 }
 0x796   :  { %2257 = vmatpush.xpose.msk.msra.mxu3 %vm605_vm1, %v3411_v53  ;;  %v1488_v2 = vpop.xlane.xlu2 %1487  ;;  %v1540_v53 = vmul.f32 %v2459_v35, %v1539_v11  ;;  %v2368_v11 = vpack.i.bf16 %v3144_v49, %v3066_v45  ;;  %v2363_v45 = vpack.i.bf16 %v3081_v61, %v3148_v42  ;;  %v2378_v49 = vpack.i.bf16 %v3158_v40, %v3169_v23 }
 0x797   :  { %2460 = vrcp.f32 %v1488_v2  ;;  %v1520_v34 = vand.u32 2147483648, %v1488_v2  ;;  %v1518_v44 = vand.u32 2147483647, %v1488_v2  ;;  %vm1514_vm5 = vweird.f32 %v1488_v2 }
 0x798   :  { %v1541_v32 = vadd.f32 %v2459_v35, %v1540_v53  ;;  %v1796_v55 = vpop.permute.xlu0 %1795 }
 0x799   :  { %2246 = vmatmul.msk.f32.vlgmr.msrb.gmra.mxu3 %vm738_vm6, %v1553_v14  ;;  %v1521_v43 = vor.u32 1.1754944e-38, %v1520_v34  ;;  %vm1519_vm9 = vcmp.eq.f32.partialorder %v1518_v44, 8.507059e+37 }
 0x79a   :  { %2258 = vmatpush.xpose.msk.msra.mxu3 %vm605_vm1, %v1758_v25  ;;  %v1548_v25 = vand.u32 2147483648, %v3452_v9  ;;  %v1545_v33 = vsel %vm1544_vm11, %v2459_v35, %v1541_v32 }
 0x79c   :  { %v1549_v57 = vor.u32 1.1754944e-38, %v1548_v25 }
 0x79d   :  { %v2461_v1 = vpop.eup %2460 }
 0x79e   :  { %v1510_v22 = vmul.f32 %v2461_v1, %v1488_v2  ;;  %vm1515_vm4 = vweird.f32 %v2461_v1  ;;  %v1550_v15 = vsel %vm1547_vm12, %v1549_v57, %v1545_v33 }
 0x79f   :  { %vm1516_vm7 = vmor %vm1514_vm5, %vm1515_vm4  ;;  %v1554_v37 = vmul.f32 %v3425_v29, %v1550_v15 }
 0x7a0   :  { %v1511_v41 = vsub.f32 1.0, %v1510_v22 }
 0x7a1   :  { %2259 = vmatmul.msk.f32.vlgmr.msra.gmra.mxu3 %vm605_vm1, %v3419_v19  ;;  %v1798_v19 = vpop.permute.xlu2 %1797 }
 0x7a2   :  { %v1512_v24 = vmul.f32 %v2461_v1, %v1511_v41 }
 0x7a4   :  { %v1513_v18 = vadd.f32 %v2461_v1, %v1512_v24 }
 0x7a6   :  { %v1517_v30 = vsel %vm1516_vm7, %v2461_v1, %v1513_v18 }
 0x7a7   :  { %v1522_v31 = vsel %vm1519_vm9, %v1521_v43, %v1517_v30 }
 0x7a8   :  { %v1552_v52 = vmul.f32 %v3442_v58, %v1522_v31  ;;  %v1792_v58 = vpop.permute.xlu1 %1791  ;;  %v2373_v31 = vpack.i.bf16 %v3136_v21, %v3166_v51 }
 0x7a9   :  { %v1794_v39 = vpop.permute.xlu2 %1793 }
 0x7aa   :  { %2245 = vmatmul.msk.f32.vlgmr.msra.gmra.mxu1 %vm738_vm6, %v1552_v52 }
 0x7ab   :  { %2260 = vmatpush.xpose.msk.msra.mxu1 %vm605_vm1, %v1798_v19 }
 0x7af   :  { %2261 = vmatpush.xpose.msk.msra.mxu1 %vm605_vm1, %v1796_v55 }
 0x7b2   :  { %2247 = vmatmul.msk.f32.vlgmr.msrb.gmra.mxu1 %vm738_vm6, %v1554_v37 }
 0x7b3   :  { %2262 = vmatpush.xpose.msk.msra.mxu1 %vm605_vm1, %v1794_v39 }
 0x7ba   :  { %2263 = vmatmul.msk.f32.vlgmr.msra.gmra.mxu1 %vm605_vm1, %v1792_v58 }
 0x7d0   :  { %v1833_v9 = vpop.xlane.xlu0 %1832 }
 0x7d1   :  { %v1843_v50 = vsub.f32 %v3454_v63, %v1833_v9 }
 0x7d3   :  { %v1847_v10 = vmul.f32 1.442695, %v1843_v50 }
 0x7d5   :  { %2462 = vpow2.f32 %v1847_v10 }
 0x7da   :  { %v1752_v16 = vpop.f32.mrf.mxu0 }
 0x7db   :  { %v1828_v27 = vmul.f32 0.17677669, %v1752_v16  ;;  %v3490_v54 = vpop.eup %2462 }
 0x7dc   :  { %v1855_v29 = vsel %vm738_vm6, %v3490_v54, 0.0 }
 0x7dd   :  { %v1834_v36 = vsel %vm738_vm6, %v1828_v27, -inf }
 0x7de   :  { %1835 = vmax.xlane.f32.xlu2 %v1834_v36 }
 0x7e6   :  { %1856 = vadd.xlane.f32.xlu2 %v1855_v29 }
 0x814   :  { %v1584_v7 = vpop.f32.mrf.mxu3 }
 0x81c   :  { %v1648_v12 = vpop.f32.mrf.mxu3 }
 0x824   :  { %v1788_v28 = vpop.f32.mrf.mxu3 }
 0x825   :  { %v1829_v4 = vmul.f32 0.17677669, %v1788_v28 }
 0x827   :  { %v1616_v3 = vpop.f32.mrf.mxu1  ;;  %v1837_v63 = vsel %vm738_vm6, %v1829_v4, -inf }
 0x828   :  { %1838 = vmax.xlane.f32.xlu1 %v1837_v63 }
 0x82f   :  { %v1680_v17 = vpop.f32.mrf.mxu1 }
 0x837   :  { %v1824_v46 = vpop.f32.mrf.mxu1 }
 0x838   :  { %v1830_v2 = vmul.f32 0.17677669, %v1824_v46 }
 0x83a   :  { %v1840_v35 = vsel %vm738_vm6, %v1830_v2, -inf }
 0x83b   :  { %1841 = vmax.xlane.f32.xlu0 %v1840_v35 }
 0x84f   :  { %2359 = vrot.lane.b32.xlu0 %v3161_v48, %s2692_s12 }
 0x851   :  { %v1836_v14 = vpop.xlane.xlu2 %1835 }
 0x852   :  { %v1844_v59 = vsub.f32 %v1828_v27, %v1836_v14 }
 0x854   :  { %v1849_v1 = vmul.f32 1.442695, %v1844_v59 }
 0x856   :  { %2464 = vpow2.f32 %v1849_v1 }
 0x857   :  { %2369 = vrot.lane.b32.xlu0 %v2368_v11, %s2692_s12 }
 0x859   :  { %v1857_v44 = vpop.xlane.xlu2 %1856 }
 0x85a   :  { %v1878_v33 = vand.u32 2147483648, %v1857_v44  ;;  %vm1872_vm14 = vweird.f32 %v1857_v44  ;;  %v1876_v57 = vand.u32 2147483647, %v1857_v44 }
 0x85c   :  { %v3501_v22 = vpop.eup %2464  ;;  %v1879_v55 = vor.u32 1.1754944e-38, %v1878_v33  ;;  %vm1877_vm0 = vcmp.eq.f32.partialorder %v1876_v57, 8.507059e+37  ;;  %v2128_v33 = vld [vmem:[#allocation13 + $0x58] sm:$0xff]  ;;  %v2127_v57 = vld [vmem:[#allocation13 + $0x50] sm:$0xff] }
 0x85d   :  { %v1858_v41 = vsel %vm738_vm6, %v3501_v22, 0.0 }
 0x85e   :  { %1859 = vadd.xlane.f32.xlu1 %v1858_v41 }
 0x85f   :  { %1991 = vrot.lane.b32.xlu0 %v3132_v60, %s2692_s12 }
 0x867   :  { %2023 = vrot.lane.b32.xlu0 %v3156_v26, %s2692_s12 }
 0x86f   :  { %2075 = vrot.lane.b32.xlu0 %v1584_v7, %s2691_s6 }
 0x877   :  { %2364 = vrot.lane.b32.xlu1 %v2363_v45, %s2692_s12 }
 0x87f   :  { %2379 = vrot.lane.b32.xlu1 %v2378_v49, %s2692_s12 }
 0x887   :  { %2384 = vrot.lane.b32.xlu1 %v2383_v38, %s2692_s12 }
 0x88f   :  { %2077 = vrot.lane.b32.xlu1 %v1616_v3, %s2691_s6 }
 0x897   :  { %2079 = vrot.lane.b32.xlu1 %v1648_v12, %s2691_s6 }
 0x89b   :  { %v1839_v60 = vpop.xlane.xlu1 %1838 }
 0x89c   :  { %v1845_v26 = vsub.f32 %v1829_v4, %v1839_v60 }
 0x89e   :  { %v1851_v40 = vmul.f32 1.442695, %v1845_v26 }
 0x89f   :  { %2081 = vrot.lane.b32.xlu1 %v1680_v17, %s2691_s6 }
 0x8ae   :  { %v1842_v61 = vpop.xlane.xlu0 %1841 }
 0x8af   :  { %v1846_v42 = vsub.f32 %v1830_v2, %v1842_v61 }
 0x8b1   :  { %v1853_v48 = vmul.f32 1.442695, %v1846_v42 }
 0x8b3   :  { %2466 = vpow2.f32 %v1853_v48 }
 0x8b4   :  { %2468 = vpow2.f32 %v1851_v40 }
 0x8b5   :  { %2470 = vrcp.f32 %v1857_v44 }
 0x8b9   :  { %v3523_v23 = vpop.eup %2466 }
 0x8ba   :  { %v1864_v13 = vsel %vm738_vm6, %v3523_v23, 0.0  ;;  %v3527_v20 = vpop.eup %2468 }
 0x8bb   :  { %1865 = vadd.xlane.f32.xlu2 %v1864_v13  ;;  %v1861_v53 = vsel %vm738_vm6, %v3527_v20, 0.0  ;;  %v2471_v32 = vpop.eup %2470 }
 0x8bc   :  { %v1868_v30 = vmul.f32 %v2471_v32, %v1857_v44  ;;  %vm1873_vm13 = vweird.f32 %v2471_v32 }
 0x8bd   :  { %vm1874_vm15 = vmor %vm1872_vm14, %vm1873_vm13 }
 0x8be   :  { %v1869_v25 = vsub.f32 1.0, %v1868_v30 }
 0x8c0   :  { %v1870_v62 = vmul.f32 %v2471_v32, %v1869_v25 }
 0x8c1   :  { %v2360_v38 = vpop.permute.xlu0 %2359 }
 0x8c2   :  { %v2361_v34 = vunpack.i.l.bf16 %v2360_v38  ;;  %v2362_v24 = vunpack.i.h.bf16 %v2360_v38  ;;  %v1871_v19 = vadd.f32 %v2471_v32, %v1870_v62  ;;  %v2131_v62 = vld [vmem:[#allocation13 + $0x70] sm:$0xff] }
 0x8c3   :  { %1862 = vadd.xlane.f32.xlu2 %v1861_v53 }
 0x8c4   :  { %1952 = vmatpush.msrb.mxu2 %v2361_v34  ;;  %v1875_v15 = vsel %vm1874_vm15, %v2471_v32, %v1871_v19  ;;  %v2130_v19 = vld [vmem:[#allocation13 + $0x68] sm:$0xff]  ;;  %vm2112_vm15 = vcmask 785408  }
 0x8c5   :  { %v1880_v37 = vsel %vm1877_vm0, %v1879_v55, %v1875_v15  ;;  %v2126_v15 = vld [vmem:[#allocation13 + $0x48] sm:$0xff]  ;;  %v2125_v55 = vld [vmem:[#allocation13 + $0x40] sm:$0xff] }
 0x8c6   :  { %1953 = vmatpush.msrb.mxu2 %v2362_v24  ;;  %v1923_v50 = vmul.f32 %v3490_v54, %v1880_v37  ;;  %v2124_v37 = vld [vmem:[#allocation13 + $0x38] sm:$0xff] }
 0x8c9   :  { %v2370_v18 = vpop.permute.xlu0 %2369 }
 0x8ca   :  { %v2372_v43 = vunpack.i.h.bf16 %v2370_v18  ;;  %v2371_v21 = vunpack.i.l.bf16 %v2370_v18 }
 0x8cc   :  { %2016 = vmatpush.msrb.mxu3 %v2372_v43 }
 0x8d1   :  { %v1860_v52 = vpop.xlane.xlu1 %1859  ;;  %v1992_v51 = vpop.permute.xlu0 %1991 }
 0x8d2   :  { %2472 = vrcp.f32 %v1860_v52  ;;  %v1892_v46 = vand.u32 2147483648, %v1860_v52  ;;  %vm1886_vm3 = vweird.f32 %v1860_v52  ;;  %v1890_v2 = vand.u32 2147483647, %v1860_v52 }
 0x8d4   :  { %v1893_v41 = vor.u32 1.1754944e-38, %v1892_v46  ;;  %vm1891_vm7 = vcmp.eq.f32.partialorder %v1890_v2, 8.507059e+37 }
 0x8d8   :  { %v2473_v29 = vpop.eup %2472 }
 0x8d9   :  { %v2024_v36 = vpop.permute.xlu0 %2023  ;;  %v1882_v7 = vmul.f32 %v2473_v29, %v1860_v52  ;;  %vm1887_vm2 = vweird.f32 %v2473_v29  ;;  %v2129_v52 = vld [vmem:[#allocation13 + $0x60] sm:$0xff] }
 0x8da   :  { %vm1888_vm4 = vmor %vm1886_vm3, %vm1887_vm2 }
 0x8db   :  { %2374 = vrot.lane.b32.xlu2 %v2373_v31, %s2692_s12  ;;  %v1883_v12 = vsub.f32 1.0, %v1882_v7  ;;  %v2132_v31 = vld [vmem:[#allocation13 + $0x78] sm:$0xff] }
 0x8dd   :  { %v1884_v54 = vmul.f32 %v2473_v29, %v1883_v12 }
 0x8df   :  { %v1885_v3 = vadd.f32 %v2473_v29, %v1884_v54 }
 0x8e1   :  { %v1889_v59 = vsel %vm1888_vm4, %v2473_v29, %v1885_v3 }
 0x8e2   :  { %v1894_v60 = vsel %vm1891_vm7, %v1893_v41, %v1889_v59 }
 0x8e3   :  { %v1924_v53 = vmul.f32 %v3501_v22, %v1894_v60 }
 0x8e9   :  { %v2365_v39 = vpop.permute.xlu1 %2364 }
 0x8ea   :  { %v2367_v58 = vunpack.i.h.bf16 %v2365_v39  ;;  %v2366_v9 = vunpack.i.l.bf16 %v2365_v39 }
 0x8ec   :  { %1954 = vmatpush.msrb.mxu2 %v2366_v9  ;;  %1984 = vmatpush.msrb.mxu0 %v2367_v58  ;;  %v2122_v58 = vld [vmem:[#allocation13 + $0x28] sm:$0xff]  ;;  %v2121_v9 = vld [vmem:[#allocation13 + $0x20] sm:$0xff] }
 0x8ed   :  { %2264 = vmatmul.msk.f32.vlgmr.msrb.gmra.mxu2 %vm738_vm6, %v1923_v50  ;;  %v2120_v50 = vld [vmem:[#allocation13 + $0x18] sm:$0xff] }
 0x8ee   :  { %1985 = vmatpush.msrb.mxu0 %v2371_v21  ;;  %2133 = vmatpush.msra.mxu2 %v2132_v31  ;;  %v2119_v21 = vld [vmem:[#allocation13 + $0x10] sm:$0xff] }
 0x8f0   :  { %2134 = vmatpush.msra.mxu2 %v2131_v62 }
 0x8f1   :  { %v2380_v10 = vpop.permute.xlu1 %2379 }
 0x8f2   :  { %v2381_v16 = vunpack.i.l.bf16 %v2380_v10  ;;  %v2382_v27 = vunpack.i.h.bf16 %v2380_v10  ;;  %2135 = vmatpush.msra.mxu2 %v2130_v19  ;;  %v2117_v10 = vld [vmem:[#allocation13] sm:$0xff] }
 0x8f4   :  { %2048 = vmatpush.msrb.mxu1 %v2381_v16  ;;  %2136 = vmatpush.msra.mxu2 %v2129_v52 }
 0x8f6   :  { %2049 = vmatpush.msrb.mxu1 %v2382_v27  ;;  %2137 = vmatpush.msra.mxu2 %v2128_v33 }
 0x8f8   :  { %2050 = vmatpush.msrb.mxu1 %v2024_v36  ;;  %2138 = vmatpush.msra.mxu2 %v2127_v57  ;;  %v2076_v36 = vpop.permute.xlu0 %2075 }
 0x8fa   :  { %2139 = vmatpush.msra.mxu2 %v2126_v15 }
 0x8fc   :  { %2140 = vmatpush.msra.mxu2 %v2125_v55 }
 0x8fe   :  { %2141 = vmatpush.msra.mxu2 %v2124_v37 }
 0x92e   :  { %v1866_v28 = vpop.xlane.xlu2 %1865 }
 0x92f   :  { %2474 = vrcp.f32 %v1866_v28  ;;  %v1920_v14 = vand.u32 2147483648, %v1866_v28  ;;  %v1918_v11 = vand.u32 2147483647, %v1866_v28  ;;  %vm1914_vm8 = vweird.f32 %v1866_v28 }
 0x931   :  { %v1921_v61 = vor.u32 1.1754944e-38, %v1920_v14  ;;  %vm1919_vm10 = vcmp.eq.f32.partialorder %v1918_v11, 8.507059e+37 }
 0x935   :  { %v2475_v4 = vpop.eup %2474 }
 0x936   :  { %v1910_v63 = vmul.f32 %v2475_v4, %v1866_v28  ;;  %v1863_v17 = vpop.xlane.xlu2 %1862  ;;  %vm1915_vm5 = vweird.f32 %v2475_v4 }
 0x937   :  { %2476 = vrcp.f32 %v1863_v17  ;;  %vm1916_vm9 = vmor %vm1914_vm8, %vm1915_vm5  ;;  %v1906_v44 = vand.u32 2147483648, %v1863_v17  ;;  %v1904_v43 = vand.u32 2147483647, %v1863_v17  ;;  %vm1900_vm12 = vweird.f32 %v1863_v17 }
 0x938   :  { %v1911_v35 = vsub.f32 1.0, %v1910_v63 }
 0x939   :  { %v1907_v30 = vor.u32 1.1754944e-38, %v1906_v44  ;;  %vm1905_vm14 = vcmp.eq.f32.partialorder %v1904_v43, 8.507059e+37 }
 0x93a   :  { %v1912_v1 = vmul.f32 %v2475_v4, %v1911_v35 }
 0x93c   :  { %v1913_v45 = vadd.f32 %v2475_v4, %v1912_v1 }
 0x93d   :  { %v2477_v49 = vpop.eup %2476 }
 0x93e   :  { %v1917_v42 = vsel %vm1916_vm9, %v2475_v4, %v1913_v45  ;;  %v1896_v26 = vmul.f32 %v2477_v49, %v1863_v17  ;;  %v2375_v48 = vpop.permute.xlu2 %2374  ;;  %vm1901_vm11 = vweird.f32 %v2477_v49 }
 0x93f   :  { %v1922_v40 = vsel %vm1919_vm10, %v1921_v61, %v1917_v42  ;;  %v2377_v13 = vunpack.i.h.bf16 %v2375_v48  ;;  %v2376_v38 = vunpack.i.l.bf16 %v2375_v48  ;;  %vm1902_vm13 = vmor %vm1900_vm12, %vm1901_vm11 }
 0x940   :  { %v1897_v34 = vsub.f32 1.0, %v1896_v26  ;;  %v1926_v24 = vmul.f32 %v3523_v23, %v1922_v40 }
 0x941   :  { %1986 = vmatpush.msrb.mxu0 %v2376_v38  ;;  %2017 = vmatpush.msrb.mxu3 %v2377_v13 }
 0x942   :  { %v1898_v18 = vmul.f32 %v2477_v49, %v1897_v34  ;;  %2265 = vmatmul.msk.f32.vlgmr.msrb.gmra.mxu0 %vm738_vm6, %v1924_v53  ;;  %2267 = vmatmul.msk.f32.vlgmr.msrb.gmra.mxu1 %vm738_vm6, %v1926_v24 }
 0x943   :  { %2018 = vmatpush.msrb.mxu3 %v1992_v51  ;;  %v2118_v51 = vld [vmem:[#allocation13 + $0x8] sm:$0xff] }
 0x944   :  { %v1899_v32 = vadd.f32 %v2477_v49, %v1898_v18 }
 0x946   :  { %v1903_v25 = vsel %vm1902_vm13, %v2477_v49, %v1899_v32 }
 0x947   :  { %v1908_v22 = vsel %vm1905_vm14, %v1907_v30, %v1903_v25 }
 0x948   :  { %v1925_v23 = vmul.f32 %v3527_v20, %v1908_v22  ;;  %v2123_v20 = vld [vmem:[#allocation13 + $0x30] sm:$0xff] }
 0x949   :  { %2142 = vmatpush.msra.mxu2 %v2123_v20 }
 0x94a   :  { %2266 = vmatmul.msk.f32.vlgmr.msrb.gmra.mxu3 %vm738_vm6, %v1925_v23  ;;  %vm2107_vm6 = vcmask 523264  }
 0x94b   :  { %2143 = vmatpush.msra.mxu2 %v2122_v58 }
 0x94d   :  { %2144 = vmatpush.msra.mxu2 %v2121_v9 }
 0x94f   :  { %2145 = vmatpush.msra.mxu2 %v2120_v50 }
 0x951   :  { %2146 = vmatpush.msra.mxu2 %v2119_v21 }
 0x953   :  { %2147 = vmatpush.msra.mxu2 %v2118_v51 }
 0x955   :  { %2148 = vmatpush.msra.mxu2 %v2117_v10 }
 0x970   :  { %v1956_v39 = vpop.f32.mrf.mxu2 }
 0x971   :  { %2091 = vrot.lane.b32.xlu2 %v1956_v39, %s2690_s4 }
 0x979   :  { %2063 = vrot.lane.b32.xlu2 %v3403_v0, %s2692_s12  ;;  %v2385_v0 = vpop.permute.xlu1 %2384 }
 0x97a   :  { %v2386_v27 = vunpack.i.l.bf16 %v2385_v0  ;;  %v2387_v4 = vunpack.i.h.bf16 %v2385_v0 }
 0x97c   :  { %v2104_v63 = vsel %vm605_vm1, %v3297_v5, %v2387_v4 }
 0x981   :  { %2065 = vrot.lane.b32.xlu2 %v3413_v8, %s2692_s12  ;;  %v2103_v8 = vsel %vm605_vm1, %v3277_v56, %v2386_v27  ;;  %v2078_v3 = vpop.permute.xlu1 %2077 }
 0x982   :  { %v2108_v29 = vsel %vm2107_vm6, %v2103_v8, %v2076_v36  ;;  %v2109_v56 = vsel %vm2107_vm6, %v2104_v63, %v2078_v3 }
 0x989   :  { %v2080_v35 = vpop.permute.xlu1 %2079 }
 0x991   :  { %v2082_v45 = vpop.permute.xlu1 %2081 }
 0x9bf   :  { %v1988_v16 = vpop.f32.mrf.mxu0  ;;  %v2052_v54 = vpop.f32.mrf.mxu1 }
 0x9c0   :  { %2093 = vrot.lane.b32.xlu0 %v1988_v16, %s2690_s4 }
 0x9cb   :  { %v2092_v7 = vpop.permute.xlu2 %2091 }
 0x9cc   :  { %v2113_v12 = vsel %vm2112_vm15, %v2108_v29, %v2092_v7 }
 0x9cd   :  { %2149 = vmatmul.f32.vlgmr.msra.gmra.mxu2 %v2113_v12  ;;  %v2020_v28 = vpop.f32.mrf.mxu3 }
 0x9ce   :  { %2095 = vrot.lane.b32.xlu0 %v2020_v28, %s2690_s4 }
 0x9d3   :  { %v2064_v2 = vpop.permute.xlu2 %2063 }
 0x9d4   :  { %v2105_v14 = vsel %vm605_vm1, %v3280_v47, %v2064_v2 }
 0x9d5   :  { %v2110_v1 = vsel %vm2107_vm6, %v2105_v14, %v2080_v35 }
 0x9d6   :  { %2097 = vrot.lane.b32.xlu0 %v2052_v54, %s2690_s4 }
 0x9db   :  { %v2066_v41 = vpop.permute.xlu2 %2065 }
 0x9dc   :  { %v2106_v5 = vsel %vm605_vm1, %v3299_v6, %v2066_v41 }
 0x9dd   :  { %v2111_v60 = vsel %vm2107_vm6, %v2106_v5, %v2082_v45 }
 0xa32   :  { %v2094_v17 = vpop.permute.xlu0 %2093 }
 0xa33   :  { %v2114_v46 = vsel %vm2112_vm15, %v2109_v56, %v2094_v17 }
 0xa34   :  { %2152 = vmatmul.f32.gmra.mxu2 %v2114_v46 }
 0xa40   :  { %v2096_v59 = vpop.permute.xlu0 %2095 }
 0xa41   :  { %v2115_v11 = vsel %vm2112_vm15, %v2110_v1, %v2096_v59 }
 0xa42   :  { %2155 = vmatmul.f32.gmra.mxu2 %v2115_v11 }
 0xa48   :  { %v2098_v49 = vpop.permute.xlu0 %2097 }
 0xa49   :  { %v2116_v61 = vsel %vm2112_vm15, %v2111_v60, %v2098_v49 }
 0xa4a   :  { %2158 = vmatmul.f32.gmra.mxu2 %v2116_v61 }
 0xa50   :  { %v2150_v42 = vpop.f32.mrf.mxu2 }
 0xa51   :  { %2162 = vst [vmem:[#allocation14] sm:$0xff] %v2150_v42 }
 0xab7   :  { %v2153_v47 = vpop.f32.mrf.mxu2 }
 0xab8   :  { %2163 = vst [vmem:[#allocation14 + $0x8] sm:$0xff] %v2153_v47 }
 0xac5   :  { %v2156_v26 = vpop.f32.mrf.mxu2 }
 0xac6   :  { %2164 = vst [vmem:[#allocation14 + $0x10] sm:$0xff] %v2156_v26 }
 0xacd   :  { %v2159_v6 = vpop.f32.mrf.mxu2 }
 0xace   :  { %2165 = vst [vmem:[#allocation14 + $0x18] sm:$0xff] %v2159_v6 }
 0xacf   :  { %2178 = dma.vmem_to_hbm [thread:$0]  %s2171_s14, 512, %s2173_s15, [#allocation4], %s2681_s9, %s2681_s9, %s2682_s10  }
 0xad0   :  { %2678 = dma.done.wait [#allocation4], 512  }
 0xad1   :  { %2679 = vsyncadd [#allocation4], 4294966784 }
 0xad2   :  { %2183 = vsyncpa [#allocation3], 1 }
 0xad3   :  { %2184 = vsyncpa [#allocation6], 1 }
 0xad4   :  { %2185 = vsyncpa [#allocation9], 1 }
 0xad5   :  { %2186 = vsyncpa [#allocation12], 1 }
 0xad6   :  { %2187 = vsyncpa [#allocation4], 1 }

</bundles_post_ra>
